<compile_context>
chip_gen: v6e
topology: v6e:2x2x1
jax: 0.10.0
libtpu: 0.0.40
codegen_flags: <defaults>
</compile_context>

<pallas_src>
import numpy as np
import jax
import jax.numpy as jnp
from jax import lax
from jax.experimental import pallas as pl
from jax.experimental.pallas import tpu as pltpu

D_MODEL = 3
D_FF = 2048          # PyTorch default dim_feedforward
N_LAYERS = 2
D_OUT = 2
LN_EPS = 1e-5
ATTN_SCALE = 1.0 / float(np.sqrt(D_MODEL))   # nhead=1 -> head_dim = 3
PARAMS_PER_LAYER = 16

# ---- packed "small" slab layout (f32, (32, 128)); rows per layer: -----------
#   base+0..2   Wqkv (3, 9)   [q: lanes 0:3, k: 3:6, v: 6:9]
#   base+3      bqkv (1, 9)
#   base+4..6   Wo   (3, 3)
#   base+7      bo   (1, 3)
#   base+8/9    ln1 gamma / beta
#   base+10     b2   (FF second bias, (1, 3))
#   base+11/12  ln2 gamma / beta
SMALL_ROWS_PER_LAYER = 13
FINAL_W_ROW = N_LAYERS * SMALL_ROWS_PER_LAYER          # 26: final Linear weight (3, 2)
FINAL_B_ROW = FINAL_W_ROW + D_MODEL                    # 29: final Linear bias   (1, 2)
SMALL_ROWS = 32                                        # padded to a multiple of 8
SMALL_LANES = 128                                      # also the lane-dense output width


# ------------------------------ shared math -----------------------------------

def _layer_norm(x, gamma, beta):
    mu = jnp.mean(x, axis=-1, keepdims=True)
    var = jnp.mean((x - mu) ** 2, axis=-1, keepdims=True)
    return (x - mu) * lax.rsqrt(var + LN_EPS) * gamma + beta


def _tiny_matmul(x, w):
    """x: (R, K) @ w: (K, N) with tiny K -> VPU broadcast-FMAs (keeps the MXU free)."""
    acc = x[:, 0:1] * w[0:1, :]
    for k in range(1, w.shape[0]):
        acc = acc + x[:, k:k + 1] * w[k:k + 1, :]
    return acc


# --------------------------------- kernel -------------------------------------

def _encoder_layer_kernel(x, layer, bb, S, small_ref, ff1_ref, ff2_ref):
    """One post-norm TransformerEncoderLayer on folded rows x: (bb*S, D_MODEL)."""
    base = layer * SMALL_ROWS_PER_LAYER
    # small params are read at their use site from the packed slab.
    wqkv = small_ref[base + 0:base + 3, 0:3 * D_MODEL]     # (3, 9) fused q/k/v
    bqkv = small_ref[base + 3:base + 4, 0:3 * D_MODEL]     # (1, 9)
    wo = small_ref[base + 4:base + 7, 0:D_MODEL]           # (3, 3)
    bo = small_ref[base + 7:base + 8, 0:D_MODEL]
    ln1w = small_ref[base + 8:base + 9, 0:D_MODEL]
    ln1b = small_ref[base + 9:base + 10, 0:D_MODEL]
    b2 = small_ref[base + 10:base + 11, 0:D_MODEL]
    ln2w = small_ref[base + 11:base + 12, 0:D_MODEL]
    ln2b = small_ref[base + 12:base + 13, 0:D_MODEL]

    # ---- single-head self attention (d_model=3 projections on the VPU) ----
    qkv = _tiny_matmul(x, wqkv) + bqkv                     # (R, 9)
    q = qkv[:, 0:D_MODEL].reshape(bb, S, D_MODEL)
    k = qkv[:, D_MODEL:2 * D_MODEL].reshape(bb, S, D_MODEL)
    v = qkv[:, 2 * D_MODEL:3 * D_MODEL].reshape(bb, S, D_MODEL)
    s = jnp.einsum("bqd,bkd->bqk", q, k,
                   preferred_element_type=jnp.float32) * ATTN_SCALE   # (bb, S, S)
    s = s - jnp.max(s, axis=-1, keepdims=True)
    e = jnp.exp(s)
    denom = jnp.sum(e, axis=-1, keepdims=True)
    r = pl.reciprocal(denom, approx=True)                  # EUP slot
    r = r * (2.0 - denom * r)                              # one Newton step -> ~exact
    attn = e * r
    ctx = jnp.einsum("bqk,bkd->bqd", attn, v,
                     preferred_element_type=jnp.float32).reshape(bb * S, D_MODEL)
    sa = _tiny_matmul(ctx, wo) + bo                        # out_proj on the VPU
    x = _layer_norm(x + sa, ln1w, ln1b)

    # ---- feed-forward (ReLU); bf16 weight slabs upcast at use, f32 accumulate ----
    ff1_l = ff1_ref[layer].astype(jnp.float32)             # (4, 2048): rows 0:3 w1, row 3 b1
    w1 = ff1_l[0:D_MODEL, :]
    b1 = ff1_l[D_MODEL:D_MODEL + 1, :]
    h = jnp.maximum(jnp.dot(x, w1, preferred_element_type=jnp.float32) + b1, 0.0)
    w2 = ff2_ref[layer].astype(jnp.float32)                # (3, 2048) lane-dense
    ff = lax.dot_general(h, w2, (((1,), (1,)), ((), ())),  # contract the 2048 axis
                         preferred_element_type=jnp.float32) + b2
    x = _layer_norm(x + ff, ln2w, ln2b)
    return x


def _aggregator_kernel(x_ref, small_ref, ff1_ref, ff2_ref, out_ref):
    bb, S, _ = x_ref.shape
    R = bb * S
    x = x_ref[...].reshape(R, D_MODEL)                     # (R, 3), batch-major rows

    for layer in range(N_LAYERS):
        x = _encoder_layer_kernel(x, layer, bb, S, small_ref, ff1_ref, ff2_ref)

    # mean-pool over the sequence, then the final Linear(3 -> 2) on the VPU.
    pooled = jnp.mean(x.reshape(bb, S, D_MODEL), axis=1)            # (bb, 3)
    wl = small_ref[FINAL_W_ROW:FINAL_W_ROW + D_MODEL, 0:D_OUT]      # (3, 2)
    bl = small_ref[FINAL_B_ROW:FINAL_B_ROW + 1, 0:D_OUT]            # (1, 2)
    y = _tiny_matmul(pooled, wl) + bl                               # (bb, 2)

    # lane-dense writeback: full (bb, 1, 128) block, valid data in lanes 0:2.
    out_ref[...] = jnp.zeros_like(out_ref)
    out_ref[:, :, 0:D_OUT] = y.reshape(bb, 1, D_OUT)


# --------------------------------- wrapper -------------------------------------

def transformer_aggregator(point_estimate, displacements, packed_params,
                           num_batch_blocks=None):
    """point_estimate: (S, B, 2), displacements: (S, B, 1)  ->  (B, 2)."""
    small, ff1, ff2 = packed_params
    S, B, _ = point_estimate.shape

    # concat + batch-major transpose happen in XLA (fuse for free); the kernel gets
    # a single (B, S, 3) input instead of two streams + an in-kernel scratch concat.
    x_in = jnp.concatenate([point_estimate, displacements], axis=-1)     # (S, B, 3)
    x_in = jnp.transpose(x_in, (1, 0, 2)).astype(jnp.float32)            # (B, S, 3)

    if num_batch_blocks is None:
        # Single grid step by default: v5e/v6e have one TensorCore, so splitting the
        # batch is a serial loop with doubled per-step overhead. Only split for v7x's
        # two TCs once each core has enough rows (>= ~256) to amortize the split and
        # the duplicated weight-slab DMA.
        num_batch_blocks = 2 if (B % 2 == 0 and (B // 2) * S >= 256) else 1
    nb = num_batch_blocks
    assert B % nb == 0, "batch must be divisible by num_batch_blocks"
    bb = B // nb
    # NOTE: if batch scales up, keep bb*S a multiple of 8 and in the few-hundred range
    # so the f32 (bb*S, 2048) FF intermediate stays well inside v7x's 64 MiB VMEM.

    grid_spec = pltpu.PrefetchScalarGridSpec(
        num_scalar_prefetch=0,
        grid=(nb,),
        in_specs=[
            pl.BlockSpec((bb, S, D_MODEL), lambda i: (i, 0, 0)),
            pl.BlockSpec(small.shape, lambda i: (0, 0)),       # weights resident across grid
            pl.BlockSpec(ff1.shape, lambda i: (0, 0, 0)),
            pl.BlockSpec(ff2.shape, lambda i: (0, 0, 0)),
        ],
        out_specs=pl.BlockSpec((bb, 1, SMALL_LANES), lambda i: (i, 0, 0)),
    )
    out = pl.pallas_call(
        _aggregator_kernel,
        out_shape=jax.ShapeDtypeStruct((B, 1, SMALL_LANES), jnp.float32),
        grid_spec=grid_spec,
        compiler_params=pltpu.CompilerParams(dimension_semantics=("parallel",)),
    )(x_in, small, ff1, ff2)
    return out[:, 0, 0:D_OUT]


# --------------------------- parameter packing ---------------------------------

def pack_params(params):
    """Pack the raw (in, out)-layout params into the 3 slabs the kernel consumes."""
    layer_params = [params[i * PARAMS_PER_LAYER:(i + 1) * PARAMS_PER_LAYER]
                    for i in range(N_LAYERS)]
    wl, bl = np.asarray(params[-2]), np.asarray(params[-1])

    small = np.zeros((SMALL_ROWS, SMALL_LANES), np.float32)
    ff1 = np.zeros((N_LAYERS, 4, D_FF), np.float32)        # per layer: rows 0:3 w1, row 3 b1
    ff2 = np.zeros((N_LAYERS, D_MODEL, D_FF), np.float32)  # per layer: w2 lane-dense (3, 2048)

    for l, p in enumerate(layer_params):
        (wq, bq, wk, bk, wv, bv, wo, bo,
         ln1w, ln1b, w1, b1, w2, b2, ln2w, ln2b) = [np.asarray(t) for t in p]
        base = l * SMALL_ROWS_PER_LAYER
        small[base + 0:base + 3, 0:3] = wq
        small[base + 0:base + 3, 3:6] = wk
        small[base + 0:base + 3, 6:9] = wv
        small[base + 3, 0:3] = bq[0]
        small[base + 3, 3:6] = bk[0]
        small[base + 3, 6:9] = bv[0]
        small[base + 4:base + 7, 0:3] = wo
        small[base + 7, 0:3] = bo[0]
        small[base + 8, 0:3] = ln1w[0]
        small[base + 9, 0:3] = ln1b[0]
        small[base + 10, 0:3] = b2[0]
        small[base + 11, 0:3] = ln2w[0]
        small[base + 12, 0:3] = ln2b[0]
        ff1[l, 0:3, :] = w1                                # (3, 2048) lane-dense
        ff1[l, 3, :] = b1[0]
        ff2[l, :, :] = w2.T                                # (2048, 3) -> (3, 2048)

    small[FINAL_W_ROW:FINAL_W_ROW + D_MODEL, 0:D_OUT] = wl
    small[FINAL_B_ROW, 0:D_OUT] = bl[0]
    # bf16 weight slabs halve the dominant HBM->VMEM DMA; upcast to f32 in-kernel.
    return (jnp.asarray(small),
            jnp.asarray(ff1).astype(jnp.bfloat16),
            jnp.asarray(ff2).astype(jnp.bfloat16))


# ---------------------------- deterministic params -----------------------------

def init_params(key):
    ks = iter(jax.random.split(key, 64))

    def w(shape, scale=0.2):
        return scale * jax.random.normal(next(ks), shape, dtype=jnp.float32)

    params = []
    for _ in range(N_LAYERS):
        # q, k, v projections (in_proj split into 3), pre-transposed to (in, out)
        for _qkv in range(3):
            params += [w((D_MODEL, D_MODEL)), w((1, D_MODEL))]
        # out_proj
        params += [w((D_MODEL, D_MODEL)), w((1, D_MODEL))]
        # norm1
        params += [jnp.ones((1, D_MODEL), jnp.float32), jnp.zeros((1, D_MODEL), jnp.float32)]
        # feed-forward: linear1 (3 -> 2048), linear2 (2048 -> 3)
        params += [w((D_MODEL, D_FF), 0.05), w((1, D_FF), 0.05)]
        params += [w((D_FF, D_MODEL), 0.02), w((1, D_MODEL), 0.05)]
        # norm2
        params += [jnp.ones((1, D_MODEL), jnp.float32), jnp.zeros((1, D_MODEL), jnp.float32)]
    # final Linear(3, 2)
    params += [w((D_MODEL, D_OUT)), w((1, D_OUT))]
    return params


# ------------------------------ pure-JAX reference ------------------------------

def _reference_encoder_layer(x, p):
    (wq, bq, wk, bk, wv, bv, wo, bo,
     ln1w, ln1b, w1, b1, w2, b2, ln2w, ln2b) = p
    q = x @ wq + bq
    k = x @ wk + bk
    v = x @ wv + bv
    s = (q @ k.T) * ATTN_SCALE
    s = s - jnp.max(s, axis=-1, keepdims=True)
    e = jnp.exp(s)
    attn = e / jnp.sum(e, axis=-1, keepdims=True)
    sa = (attn @ v) @ wo + bo
    x = _layer_norm(x + sa, ln1w, ln1b)
    h = jnp.maximum(x @ w1 + b1, 0.0)
    ff = h @ w2 + b2
    return _layer_norm(x + ff, ln2w, ln2b)


def reference(point_estimate, displacements, params):
    x = jnp.concatenate([point_estimate, displacements], axis=-1)   # (S, B, 3)
    layer_params = [params[i * PARAMS_PER_LAYER:(i + 1) * PARAMS_PER_LAYER]
                    for i in range(N_LAYERS)]
    wl, bl = params[-2], params[-1]
    outs = []
    for b in range(x.shape[1]):
        xb = x[:, b, :]
        for lp in layer_params:
            xb = _reference_encoder_layer(xb, lp)
        pooled = jnp.mean(xb, axis=0, keepdims=True)
        outs.append(pooled @ wl + bl)
    return jnp.concatenate(outs, axis=0)


if __name__ == "__main__":
    key = jax.random.PRNGKey(0)
    kp, kd, kw = jax.random.split(key, 3)
    S, B = 8, 2
    point_estimate = jax.random.normal(kp, (S, B, 2), dtype=jnp.float32)
    displacements = jax.random.normal(kd, (S, B, 1), dtype=jnp.float32)
    params = init_params(kw)
    packed = pack_params(params)

    out = transformer_aggregator(point_estimate, displacements, packed)
    out = jax.block_until_ready(out)

    ref = reference(point_estimate, displacements, params)
    np.testing.assert_allclose(np.asarray(out), np.asarray(ref), rtol=1e-2, atol=1e-2)
    print("KERNEL_OK")
</pallas_src>

<mosaic_0001>
module attributes {stable_mosaic.version = 11 : i64} {
  func.func @_aggregator_kernel(%arg0: i32, %arg1: memref<2x8x3xf32, #tpu.memory_space<vmem>>, %arg2: memref<32x128xf32, #tpu.memory_space<vmem>>, %arg3: memref<2x4x2048xbf16, #tpu.memory_space<vmem>>, %arg4: memref<2x3x2048xbf16, #tpu.memory_space<vmem>>, %arg5: memref<2x1x128xf32, #tpu.memory_space<vmem>>) attributes {dimension_semantics = [#tpu.dimension_semantics<parallel>], iteration_bounds = array<i64: 1>, scalar_prefetch = 0 : i64, scratch_operands = 0 : i64, tpu.core_type = #tpu.core_type<tc>, window_params = [{transform_indices = @transform_0, window_bounds = array<i64: 2, 8, 3>}, {pipeline_mode = #tpu.pipeline_mode<synchronous>, transform_indices = @transform_1, window_bounds = array<i64: 32, 128>}, {pipeline_mode = #tpu.pipeline_mode<synchronous>, transform_indices = @transform_2, window_bounds = array<i64: 2, 4, 2048>}, {pipeline_mode = #tpu.pipeline_mode<synchronous>, transform_indices = @transform_3, window_bounds = array<i64: 2, 3, 2048>}, {transform_indices = @transform_4, window_bounds = array<i64: 2, 1, 128>}]} {
    %c0 = arith.constant 0 : index
    %c0_0 = arith.constant 0 : index
    %c0_1 = arith.constant 0 : index
    %0 = vector.load %arg1[%c0, %c0_0, %c0_1] : memref<2x8x3xf32, #tpu.memory_space<vmem>>, vector<2x8x3xf32>
    %1 = vector.shape_cast %0 : vector<2x8x3xf32> to vector<16x3xf32>
    %c0_2 = arith.constant 0 : index
    %c0_3 = arith.constant 0 : index
    %2 = vector.load %arg2[%c0_2, %c0_3] : memref<32x128xf32, #tpu.memory_space<vmem>>, vector<3x9xf32>
    %c3 = arith.constant 3 : index
    %c0_4 = arith.constant 0 : index
    %3 = vector.load %arg2[%c3, %c0_4] : memref<32x128xf32, #tpu.memory_space<vmem>>, vector<1x9xf32>
    %c4 = arith.constant 4 : index
    %c0_5 = arith.constant 0 : index
    %4 = vector.load %arg2[%c4, %c0_5] : memref<32x128xf32, #tpu.memory_space<vmem>>, vector<3x3xf32>
    %c7 = arith.constant 7 : index
    %c0_6 = arith.constant 0 : index
    %5 = vector.load %arg2[%c7, %c0_6] : memref<32x128xf32, #tpu.memory_space<vmem>>, vector<1x3xf32>
    %c8 = arith.constant 8 : index
    %c0_7 = arith.constant 0 : index
    %6 = vector.load %arg2[%c8, %c0_7] : memref<32x128xf32, #tpu.memory_space<vmem>>, vector<1x3xf32>
    %c9 = arith.constant 9 : index
    %c0_8 = arith.constant 0 : index
    %7 = vector.load %arg2[%c9, %c0_8] : memref<32x128xf32, #tpu.memory_space<vmem>>, vector<1x3xf32>
    %c10 = arith.constant 10 : index
    %c0_9 = arith.constant 0 : index
    %8 = vector.load %arg2[%c10, %c0_9] : memref<32x128xf32, #tpu.memory_space<vmem>>, vector<1x3xf32>
    %c11 = arith.constant 11 : index
    %c0_10 = arith.constant 0 : index
    %9 = vector.load %arg2[%c11, %c0_10] : memref<32x128xf32, #tpu.memory_space<vmem>>, vector<1x3xf32>
    %c12 = arith.constant 12 : index
    %c0_11 = arith.constant 0 : index
    %10 = vector.load %arg2[%c12, %c0_11] : memref<32x128xf32, #tpu.memory_space<vmem>>, vector<1x3xf32>
    %11 = vector.extract_strided_slice %1 {offsets = [0, 0], sizes = [16, 1], strides = [1, 1]} : vector<16x3xf32> to vector<16x1xf32>
    %12 = vector.extract_strided_slice %2 {offsets = [0, 0], sizes = [1, 9], strides = [1, 1]} : vector<3x9xf32> to vector<1x9xf32>
    %13 = vector.broadcast %11 : vector<16x1xf32> to vector<16x9xf32>
    %14 = vector.broadcast %12 : vector<1x9xf32> to vector<16x9xf32>
    %15 = arith.mulf %13, %14 : vector<16x9xf32>
    %16 = vector.extract_strided_slice %1 {offsets = [0, 1], sizes = [16, 1], strides = [1, 1]} : vector<16x3xf32> to vector<16x1xf32>
    %17 = vector.extract_strided_slice %2 {offsets = [1, 0], sizes = [1, 9], strides = [1, 1]} : vector<3x9xf32> to vector<1x9xf32>
    %18 = vector.broadcast %16 : vector<16x1xf32> to vector<16x9xf32>
    %19 = vector.broadcast %17 : vector<1x9xf32> to vector<16x9xf32>
    %20 = arith.mulf %18, %19 : vector<16x9xf32>
    %21 = arith.addf %15, %20 : vector<16x9xf32>
    %22 = vector.extract_strided_slice %1 {offsets = [0, 2], sizes = [16, 1], strides = [1, 1]} : vector<16x3xf32> to vector<16x1xf32>
    %23 = vector.extract_strided_slice %2 {offsets = [2, 0], sizes = [1, 9], strides = [1, 1]} : vector<3x9xf32> to vector<1x9xf32>
    %24 = vector.broadcast %22 : vector<16x1xf32> to vector<16x9xf32>
    %25 = vector.broadcast %23 : vector<1x9xf32> to vector<16x9xf32>
    %26 = arith.mulf %24, %25 : vector<16x9xf32>
    %27 = arith.addf %21, %26 : vector<16x9xf32>
    %28 = vector.broadcast %3 : vector<1x9xf32> to vector<16x9xf32>
    %29 = arith.addf %27, %28 : vector<16x9xf32>
    %30 = vector.extract_strided_slice %29 {offsets = [0, 0], sizes = [16, 3], strides = [1, 1]} : vector<16x9xf32> to vector<16x3xf32>
    %31 = vector.shape_cast %30 : vector<16x3xf32> to vector<2x8x3xf32>
    %32 = vector.extract_strided_slice %29 {offsets = [0, 3], sizes = [16, 3], strides = [1, 1]} : vector<16x9xf32> to vector<16x3xf32>
    %33 = vector.shape_cast %32 : vector<16x3xf32> to vector<2x8x3xf32>
    %34 = vector.extract_strided_slice %29 {offsets = [0, 6], sizes = [16, 3], strides = [1, 1]} : vector<16x9xf32> to vector<16x3xf32>
    %35 = vector.shape_cast %34 : vector<16x3xf32> to vector<2x8x3xf32>
    "tpu.trace_start"() <{level = 10 : i32, message = "bqd,bkd->bqk"}> : () -> ()
    %cst = arith.constant dense<0.000000e+00> : vector<2x8x8xf32>
    %36 = tpu.matmul %31, %33, %cst {dimension_numbers = #tpu.dot_dimension_numbers<[2], [2], [1], [1], [0, 0, 0, 1, 1, 1], [0], [0]>} : vector<2x8x3xf32>, vector<2x8x3xf32>, vector<2x8x8xf32> -> vector<2x8x8xf32>
    "tpu.trace_stop"() : () -> ()
    %cst_12 = arith.constant 0.577350259 : f32
    %37 = vector.broadcast %cst_12 : f32 to vector<2x8x8xf32>
    %38 = arith.mulf %36, %37 : vector<2x8x8xf32>
    %cst_13 = arith.constant dense<0xFF800000> : vector<2x8xf32>
    %39 = vector.multi_reduction <maximumf>, %38, %cst_13 [2] : vector<2x8x8xf32> to vector<2x8xf32>
    %40 = vector.shape_cast %39 : vector<2x8xf32> to vector<2x8x1xf32>
    %41 = vector.broadcast %40 : vector<2x8x1xf32> to vector<2x8x8xf32>
    %42 = arith.subf %38, %41 : vector<2x8x8xf32>
    %43 = math.exp %42 : vector<2x8x8xf32>
    %cst_14 = arith.constant dense<0.000000e+00> : vector<2x8xf32>
    %44 = vector.multi_reduction <add>, %43, %cst_14 [2] : vector<2x8x8xf32> to vector<2x8xf32>
    %45 = vector.shape_cast %44 : vector<2x8xf32> to vector<2x8x1xf32>
    %46 = tpu.reciprocal %45 {approx = true} : vector<2x8x1xf32> -> vector<2x8x1xf32>
    %47 = arith.mulf %45, %46 : vector<2x8x1xf32>
    %cst_15 = arith.constant 2.000000e+00 : f32
    %48 = vector.broadcast %cst_15 : f32 to vector<2x8x1xf32>
    %49 = arith.subf %48, %47 : vector<2x8x1xf32>
    %50 = arith.mulf %46, %49 : vector<2x8x1xf32>
    %51 = vector.broadcast %50 : vector<2x8x1xf32> to vector<2x8x8xf32>
    %52 = arith.mulf %43, %51 : vector<2x8x8xf32>
    "tpu.trace_start"() <{level = 10 : i32, message = "bqk,bkd->bqd"}> : () -> ()
    %cst_16 = arith.constant dense<0.000000e+00> : vector<2x8x3xf32>
    %53 = tpu.matmul %52, %35, %cst_16 {dimension_numbers = #tpu.dot_dimension_numbers<[2], [1], [1], [2], [0, 0, 0, 1, 1, 2], [0], [0]>} : vector<2x8x8xf32>, vector<2x8x3xf32>, vector<2x8x3xf32> -> vector<2x8x3xf32>
    "tpu.trace_stop"() : () -> ()
    %54 = vector.shape_cast %53 : vector<2x8x3xf32> to vector<16x3xf32>
    %55 = vector.extract_strided_slice %54 {offsets = [0, 0], sizes = [16, 1], strides = [1, 1]} : vector<16x3xf32> to vector<16x1xf32>
    %56 = vector.extract_strided_slice %4 {offsets = [0, 0], sizes = [1, 3], strides = [1, 1]} : vector<3x3xf32> to vector<1x3xf32>
    %57 = vector.broadcast %55 : vector<16x1xf32> to vector<16x3xf32>
    %58 = vector.broadcast %56 : vector<1x3xf32> to vector<16x3xf32>
    %59 = arith.mulf %57, %58 : vector<16x3xf32>
    %60 = vector.extract_strided_slice %54 {offsets = [0, 1], sizes = [16, 1], strides = [1, 1]} : vector<16x3xf32> to vector<16x1xf32>
    %61 = vector.extract_strided_slice %4 {offsets = [1, 0], sizes = [1, 3], strides = [1, 1]} : vector<3x3xf32> to vector<1x3xf32>
    %62 = vector.broadcast %60 : vector<16x1xf32> to vector<16x3xf32>
    %63 = vector.broadcast %61 : vector<1x3xf32> to vector<16x3xf32>
    %64 = arith.mulf %62, %63 : vector<16x3xf32>
    %65 = arith.addf %59, %64 : vector<16x3xf32>
    %66 = vector.extract_strided_slice %54 {offsets = [0, 2], sizes = [16, 1], strides = [1, 1]} : vector<16x3xf32> to vector<16x1xf32>
    %67 = vector.extract_strided_slice %4 {offsets = [2, 0], sizes = [1, 3], strides = [1, 1]} : vector<3x3xf32> to vector<1x3xf32>
    %68 = vector.broadcast %66 : vector<16x1xf32> to vector<16x3xf32>
    %69 = vector.broadcast %67 : vector<1x3xf32> to vector<16x3xf32>
    %70 = arith.mulf %68, %69 : vector<16x3xf32>
    %71 = arith.addf %65, %70 : vector<16x3xf32>
    %72 = vector.broadcast %5 : vector<1x3xf32> to vector<16x3xf32>
    %73 = arith.addf %71, %72 : vector<16x3xf32>
    %74 = arith.addf %1, %73 : vector<16x3xf32>
    %cst_17 = arith.constant dense<0.000000e+00> : vector<16xf32>
    %75 = vector.multi_reduction <add>, %74, %cst_17 [1] : vector<16x3xf32> to vector<16xf32>
    %76 = vector.shape_cast %75 : vector<16xf32> to vector<16x1xf32>
    %cst_18 = arith.constant 3.000000e+00 : f32
    %77 = vector.broadcast %cst_18 : f32 to vector<16x1xf32>
    %78 = arith.divf %76, %77 : vector<16x1xf32>
    %79 = vector.broadcast %78 : vector<16x1xf32> to vector<16x3xf32>
    %80 = arith.subf %74, %79 : vector<16x3xf32>
    %81 = arith.mulf %80, %80 : vector<16x3xf32>
    %cst_19 = arith.constant dense<0.000000e+00> : vector<16xf32>
    %82 = vector.multi_reduction <add>, %81, %cst_19 [1] : vector<16x3xf32> to vector<16xf32>
    %83 = vector.shape_cast %82 : vector<16xf32> to vector<16x1xf32>
    %cst_20 = arith.constant 3.000000e+00 : f32
    %84 = vector.broadcast %cst_20 : f32 to vector<16x1xf32>
    %85 = arith.divf %83, %84 : vector<16x1xf32>
    %86 = vector.broadcast %78 : vector<16x1xf32> to vector<16x3xf32>
    %87 = arith.subf %74, %86 : vector<16x3xf32>
    %cst_21 = arith.constant 9.99999974E-6 : f32
    %88 = vector.broadcast %cst_21 : f32 to vector<16x1xf32>
    %89 = arith.addf %85, %88 : vector<16x1xf32>
    %90 = math.rsqrt %89 : vector<16x1xf32>
    %91 = vector.broadcast %90 : vector<16x1xf32> to vector<16x3xf32>
    %92 = arith.mulf %87, %91 : vector<16x3xf32>
    %93 = vector.broadcast %6 : vector<1x3xf32> to vector<16x3xf32>
    %94 = arith.mulf %92, %93 : vector<16x3xf32>
    %95 = vector.broadcast %7 : vector<1x3xf32> to vector<16x3xf32>
    %96 = arith.addf %94, %95 : vector<16x3xf32>
    %c0_22 = arith.constant 0 : index
    %c0_23 = arith.constant 0 : index
    %c0_24 = arith.constant 0 : index
    %97 = vector.load %arg3[%c0_22, %c0_23, %c0_24] : memref<2x4x2048xbf16, #tpu.memory_space<vmem>>, vector<1x4x2048xbf16>
    %98 = vector.shape_cast %97 : vector<1x4x2048xbf16> to vector<4x2048xbf16>
    %99 = arith.extf %98 : vector<4x2048xbf16> to vector<4x2048xf32>
    %100 = vector.extract_strided_slice %99 {offsets = [0, 0], sizes = [3, 2048], strides = [1, 1]} : vector<4x2048xf32> to vector<3x2048xf32>
    %101 = vector.extract_strided_slice %99 {offsets = [3, 0], sizes = [1, 2048], strides = [1, 1]} : vector<4x2048xf32> to vector<1x2048xf32>
    %cst_25 = arith.constant dense<0.000000e+00> : vector<16x2048xf32>
    %102 = tpu.matmul %96, %100, %cst_25 {dimension_numbers = #tpu.dot_dimension_numbers<[1], [0], [0], [1], [0, 0, 1, 1], [], []>} : vector<16x3xf32>, vector<3x2048xf32>, vector<16x2048xf32> -> vector<16x2048xf32>
    %103 = vector.broadcast %101 : vector<1x2048xf32> to vector<16x2048xf32>
    %104 = arith.addf %102, %103 : vector<16x2048xf32>
    %cst_26 = arith.constant 0.000000e+00 : f32
    %105 = vector.broadcast %cst_26 : f32 to vector<16x2048xf32>
    %106 = arith.maximumf %104, %105 : vector<16x2048xf32>
    %c0_27 = arith.constant 0 : index
    %c0_28 = arith.constant 0 : index
    %c0_29 = arith.constant 0 : index
    %107 = vector.load %arg4[%c0_27, %c0_28, %c0_29] : memref<2x3x2048xbf16, #tpu.memory_space<vmem>>, vector<1x3x2048xbf16>
    %108 = vector.shape_cast %107 : vector<1x3x2048xbf16> to vector<3x2048xbf16>
    %109 = arith.extf %108 : vector<3x2048xbf16> to vector<3x2048xf32>
    %cst_30 = arith.constant dense<0.000000e+00> : vector<16x3xf32>
    %110 = tpu.matmul %106, %109, %cst_30 {dimension_numbers = #tpu.dot_dimension_numbers<[1], [1], [0], [0], [0, 0, 1, 0], [], []>} : vector<16x2048xf32>, vector<3x2048xf32>, vector<16x3xf32> -> vector<16x3xf32>
    %111 = vector.broadcast %8 : vector<1x3xf32> to vector<16x3xf32>
    %112 = arith.addf %110, %111 : vector<16x3xf32>
    %113 = arith.addf %96, %112 : vector<16x3xf32>
    %cst_31 = arith.constant dense<0.000000e+00> : vector<16xf32>
    %114 = vector.multi_reduction <add>, %113, %cst_31 [1] : vector<16x3xf32> to vector<16xf32>
    %115 = vector.shape_cast %114 : vector<16xf32> to vector<16x1xf32>
    %cst_32 = arith.constant 3.000000e+00 : f32
    %116 = vector.broadcast %cst_32 : f32 to vector<16x1xf32>
    %117 = arith.divf %115, %116 : vector<16x1xf32>
    %118 = vector.broadcast %117 : vector<16x1xf32> to vector<16x3xf32>
    %119 = arith.subf %113, %118 : vector<16x3xf32>
    %120 = arith.mulf %119, %119 : vector<16x3xf32>
    %cst_33 = arith.constant dense<0.000000e+00> : vector<16xf32>
    %121 = vector.multi_reduction <add>, %120, %cst_33 [1] : vector<16x3xf32> to vector<16xf32>
    %122 = vector.shape_cast %121 : vector<16xf32> to vector<16x1xf32>
    %cst_34 = arith.constant 3.000000e+00 : f32
    %123 = vector.broadcast %cst_34 : f32 to vector<16x1xf32>
    %124 = arith.divf %122, %123 : vector<16x1xf32>
    %125 = vector.broadcast %117 : vector<16x1xf32> to vector<16x3xf32>
    %126 = arith.subf %113, %125 : vector<16x3xf32>
    %cst_35 = arith.constant 9.99999974E-6 : f32
    %127 = vector.broadcast %cst_35 : f32 to vector<16x1xf32>
    %128 = arith.addf %124, %127 : vector<16x1xf32>
    %129 = math.rsqrt %128 : vector<16x1xf32>
    %130 = vector.broadcast %129 : vector<16x1xf32> to vector<16x3xf32>
    %131 = arith.mulf %126, %130 : vector<16x3xf32>
    %132 = vector.broadcast %9 : vector<1x3xf32> to vector<16x3xf32>
    %133 = arith.mulf %131, %132 : vector<16x3xf32>
    %134 = vector.broadcast %10 : vector<1x3xf32> to vector<16x3xf32>
    %135 = arith.addf %133, %134 : vector<16x3xf32>
    %c13 = arith.constant 13 : index
    %c0_36 = arith.constant 0 : index
    %136 = vector.load %arg2[%c13, %c0_36] : memref<32x128xf32, #tpu.memory_space<vmem>>, vector<3x9xf32>
    %c16 = arith.constant 16 : index
    %c0_37 = arith.constant 0 : index
    %137 = vector.load %arg2[%c16, %c0_37] : memref<32x128xf32, #tpu.memory_space<vmem>>, vector<1x9xf32>
    %c17 = arith.constant 17 : index
    %c0_38 = arith.constant 0 : index
    %138 = vector.load %arg2[%c17, %c0_38] : memref<32x128xf32, #tpu.memory_space<vmem>>, vector<3x3xf32>
    %c20 = arith.constant 20 : index
    %c0_39 = arith.constant 0 : index
    %139 = vector.load %arg2[%c20, %c0_39] : memref<32x128xf32, #tpu.memory_space<vmem>>, vector<1x3xf32>
    %c21 = arith.constant 21 : index
    %c0_40 = arith.constant 0 : index
    %140 = vector.load %arg2[%c21, %c0_40] : memref<32x128xf32, #tpu.memory_space<vmem>>, vector<1x3xf32>
    %c22 = arith.constant 22 : index
    %c0_41 = arith.constant 0 : index
    %141 = vector.load %arg2[%c22, %c0_41] : memref<32x128xf32, #tpu.memory_space<vmem>>, vector<1x3xf32>
    %c23 = arith.constant 23 : index
    %c0_42 = arith.constant 0 : index
    %142 = vector.load %arg2[%c23, %c0_42] : memref<32x128xf32, #tpu.memory_space<vmem>>, vector<1x3xf32>
    %c24 = arith.constant 24 : index
    %c0_43 = arith.constant 0 : index
    %143 = vector.load %arg2[%c24, %c0_43] : memref<32x128xf32, #tpu.memory_space<vmem>>, vector<1x3xf32>
    %c25 = arith.constant 25 : index
    %c0_44 = arith.constant 0 : index
    %144 = vector.load %arg2[%c25, %c0_44] : memref<32x128xf32, #tpu.memory_space<vmem>>, vector<1x3xf32>
    %145 = vector.extract_strided_slice %135 {offsets = [0, 0], sizes = [16, 1], strides = [1, 1]} : vector<16x3xf32> to vector<16x1xf32>
    %146 = vector.extract_strided_slice %136 {offsets = [0, 0], sizes = [1, 9], strides = [1, 1]} : vector<3x9xf32> to vector<1x9xf32>
    %147 = vector.broadcast %145 : vector<16x1xf32> to vector<16x9xf32>
    %148 = vector.broadcast %146 : vector<1x9xf32> to vector<16x9xf32>
    %149 = arith.mulf %147, %148 : vector<16x9xf32>
    %150 = vector.extract_strided_slice %135 {offsets = [0, 1], sizes = [16, 1], strides = [1, 1]} : vector<16x3xf32> to vector<16x1xf32>
    %151 = vector.extract_strided_slice %136 {offsets = [1, 0], sizes = [1, 9], strides = [1, 1]} : vector<3x9xf32> to vector<1x9xf32>
    %152 = vector.broadcast %150 : vector<16x1xf32> to vector<16x9xf32>
    %153 = vector.broadcast %151 : vector<1x9xf32> to vector<16x9xf32>
    %154 = arith.mulf %152, %153 : vector<16x9xf32>
    %155 = arith.addf %149, %154 : vector<16x9xf32>
    %156 = vector.extract_strided_slice %135 {offsets = [0, 2], sizes = [16, 1], strides = [1, 1]} : vector<16x3xf32> to vector<16x1xf32>
    %157 = vector.extract_strided_slice %136 {offsets = [2, 0], sizes = [1, 9], strides = [1, 1]} : vector<3x9xf32> to vector<1x9xf32>
    %158 = vector.broadcast %156 : vector<16x1xf32> to vector<16x9xf32>
    %159 = vector.broadcast %157 : vector<1x9xf32> to vector<16x9xf32>
    %160 = arith.mulf %158, %159 : vector<16x9xf32>
    %161 = arith.addf %155, %160 : vector<16x9xf32>
    %162 = vector.broadcast %137 : vector<1x9xf32> to vector<16x9xf32>
    %163 = arith.addf %161, %162 : vector<16x9xf32>
    %164 = vector.extract_strided_slice %163 {offsets = [0, 0], sizes = [16, 3], strides = [1, 1]} : vector<16x9xf32> to vector<16x3xf32>
    %165 = vector.shape_cast %164 : vector<16x3xf32> to vector<2x8x3xf32>
    %166 = vector.extract_strided_slice %163 {offsets = [0, 3], sizes = [16, 3], strides = [1, 1]} : vector<16x9xf32> to vector<16x3xf32>
    %167 = vector.shape_cast %166 : vector<16x3xf32> to vector<2x8x3xf32>
    %168 = vector.extract_strided_slice %163 {offsets = [0, 6], sizes = [16, 3], strides = [1, 1]} : vector<16x9xf32> to vector<16x3xf32>
    %169 = vector.shape_cast %168 : vector<16x3xf32> to vector<2x8x3xf32>
    "tpu.trace_start"() <{level = 10 : i32, message = "bqd,bkd->bqk"}> : () -> ()
    %cst_45 = arith.constant dense<0.000000e+00> : vector<2x8x8xf32>
    %170 = tpu.matmul %165, %167, %cst_45 {dimension_numbers = #tpu.dot_dimension_numbers<[2], [2], [1], [1], [0, 0, 0, 1, 1, 1], [0], [0]>} : vector<2x8x3xf32>, vector<2x8x3xf32>, vector<2x8x8xf32> -> vector<2x8x8xf32>
    "tpu.trace_stop"() : () -> ()
    %cst_46 = arith.constant 0.577350259 : f32
    %171 = vector.broadcast %cst_46 : f32 to vector<2x8x8xf32>
    %172 = arith.mulf %170, %171 : vector<2x8x8xf32>
    %cst_47 = arith.constant dense<0xFF800000> : vector<2x8xf32>
    %173 = vector.multi_reduction <maximumf>, %172, %cst_47 [2] : vector<2x8x8xf32> to vector<2x8xf32>
    %174 = vector.shape_cast %173 : vector<2x8xf32> to vector<2x8x1xf32>
    %175 = vector.broadcast %174 : vector<2x8x1xf32> to vector<2x8x8xf32>
    %176 = arith.subf %172, %175 : vector<2x8x8xf32>
    %177 = math.exp %176 : vector<2x8x8xf32>
    %cst_48 = arith.constant dense<0.000000e+00> : vector<2x8xf32>
    %178 = vector.multi_reduction <add>, %177, %cst_48 [2] : vector<2x8x8xf32> to vector<2x8xf32>
    %179 = vector.shape_cast %178 : vector<2x8xf32> to vector<2x8x1xf32>
    %180 = tpu.reciprocal %179 {approx = true} : vector<2x8x1xf32> -> vector<2x8x1xf32>
    %181 = arith.mulf %179, %180 : vector<2x8x1xf32>
    %cst_49 = arith.constant 2.000000e+00 : f32
    %182 = vector.broadcast %cst_49 : f32 to vector<2x8x1xf32>
    %183 = arith.subf %182, %181 : vector<2x8x1xf32>
    %184 = arith.mulf %180, %183 : vector<2x8x1xf32>
    %185 = vector.broadcast %184 : vector<2x8x1xf32> to vector<2x8x8xf32>
    %186 = arith.mulf %177, %185 : vector<2x8x8xf32>
    "tpu.trace_start"() <{level = 10 : i32, message = "bqk,bkd->bqd"}> : () -> ()
    %cst_50 = arith.constant dense<0.000000e+00> : vector<2x8x3xf32>
    %187 = tpu.matmul %186, %169, %cst_50 {dimension_numbers = #tpu.dot_dimension_numbers<[2], [1], [1], [2], [0, 0, 0, 1, 1, 2], [0], [0]>} : vector<2x8x8xf32>, vector<2x8x3xf32>, vector<2x8x3xf32> -> vector<2x8x3xf32>
    "tpu.trace_stop"() : () -> ()
    %188 = vector.shape_cast %187 : vector<2x8x3xf32> to vector<16x3xf32>
    %189 = vector.extract_strided_slice %188 {offsets = [0, 0], sizes = [16, 1], strides = [1, 1]} : vector<16x3xf32> to vector<16x1xf32>
    %190 = vector.extract_strided_slice %138 {offsets = [0, 0], sizes = [1, 3], strides = [1, 1]} : vector<3x3xf32> to vector<1x3xf32>
    %191 = vector.broadcast %189 : vector<16x1xf32> to vector<16x3xf32>
    %192 = vector.broadcast %190 : vector<1x3xf32> to vector<16x3xf32>
    %193 = arith.mulf %191, %192 : vector<16x3xf32>
    %194 = vector.extract_strided_slice %188 {offsets = [0, 1], sizes = [16, 1], strides = [1, 1]} : vector<16x3xf32> to vector<16x1xf32>
    %195 = vector.extract_strided_slice %138 {offsets = [1, 0], sizes = [1, 3], strides = [1, 1]} : vector<3x3xf32> to vector<1x3xf32>
    %196 = vector.broadcast %194 : vector<16x1xf32> to vector<16x3xf32>
    %197 = vector.broadcast %195 : vector<1x3xf32> to vector<16x3xf32>
    %198 = arith.mulf %196, %197 : vector<16x3xf32>
    %199 = arith.addf %193, %198 : vector<16x3xf32>
    %200 = vector.extract_strided_slice %188 {offsets = [0, 2], sizes = [16, 1], strides = [1, 1]} : vector<16x3xf32> to vector<16x1xf32>
    %201 = vector.extract_strided_slice %138 {offsets = [2, 0], sizes = [1, 3], strides = [1, 1]} : vector<3x3xf32> to vector<1x3xf32>
    %202 = vector.broadcast %200 : vector<16x1xf32> to vector<16x3xf32>
    %203 = vector.broadcast %201 : vector<1x3xf32> to vector<16x3xf32>
    %204 = arith.mulf %202, %203 : vector<16x3xf32>
    %205 = arith.addf %199, %204 : vector<16x3xf32>
    %206 = vector.broadcast %139 : vector<1x3xf32> to vector<16x3xf32>
    %207 = arith.addf %205, %206 : vector<16x3xf32>
    %208 = arith.addf %135, %207 : vector<16x3xf32>
    %cst_51 = arith.constant dense<0.000000e+00> : vector<16xf32>
    %209 = vector.multi_reduction <add>, %208, %cst_51 [1] : vector<16x3xf32> to vector<16xf32>
    %210 = vector.shape_cast %209 : vector<16xf32> to vector<16x1xf32>
    %cst_52 = arith.constant 3.000000e+00 : f32
    %211 = vector.broadcast %cst_52 : f32 to vector<16x1xf32>
    %212 = arith.divf %210, %211 : vector<16x1xf32>
    %213 = vector.broadcast %212 : vector<16x1xf32> to vector<16x3xf32>
    %214 = arith.subf %208, %213 : vector<16x3xf32>
    %215 = arith.mulf %214, %214 : vector<16x3xf32>
    %cst_53 = arith.constant dense<0.000000e+00> : vector<16xf32>
    %216 = vector.multi_reduction <add>, %215, %cst_53 [1] : vector<16x3xf32> to vector<16xf32>
    %217 = vector.shape_cast %216 : vector<16xf32> to vector<16x1xf32>
    %cst_54 = arith.constant 3.000000e+00 : f32
    %218 = vector.broadcast %cst_54 : f32 to vector<16x1xf32>
    %219 = arith.divf %217, %218 : vector<16x1xf32>
    %220 = vector.broadcast %212 : vector<16x1xf32> to vector<16x3xf32>
    %221 = arith.subf %208, %220 : vector<16x3xf32>
    %cst_55 = arith.constant 9.99999974E-6 : f32
    %222 = vector.broadcast %cst_55 : f32 to vector<16x1xf32>
    %223 = arith.addf %219, %222 : vector<16x1xf32>
    %224 = math.rsqrt %223 : vector<16x1xf32>
    %225 = vector.broadcast %224 : vector<16x1xf32> to vector<16x3xf32>
    %226 = arith.mulf %221, %225 : vector<16x3xf32>
    %227 = vector.broadcast %140 : vector<1x3xf32> to vector<16x3xf32>
    %228 = arith.mulf %226, %227 : vector<16x3xf32>
    %229 = vector.broadcast %141 : vector<1x3xf32> to vector<16x3xf32>
    %230 = arith.addf %228, %229 : vector<16x3xf32>
    %c1 = arith.constant 1 : index
    %c0_56 = arith.constant 0 : index
    %c0_57 = arith.constant 0 : index
    %231 = vector.load %arg3[%c1, %c0_56, %c0_57] : memref<2x4x2048xbf16, #tpu.memory_space<vmem>>, vector<1x4x2048xbf16>
    %232 = vector.shape_cast %231 : vector<1x4x2048xbf16> to vector<4x2048xbf16>
    %233 = arith.extf %232 : vector<4x2048xbf16> to vector<4x2048xf32>
    %234 = vector.extract_strided_slice %233 {offsets = [0, 0], sizes = [3, 2048], strides = [1, 1]} : vector<4x2048xf32> to vector<3x2048xf32>
    %235 = vector.extract_strided_slice %233 {offsets = [3, 0], sizes = [1, 2048], strides = [1, 1]} : vector<4x2048xf32> to vector<1x2048xf32>
    %cst_58 = arith.constant dense<0.000000e+00> : vector<16x2048xf32>
    %236 = tpu.matmul %230, %234, %cst_58 {dimension_numbers = #tpu.dot_dimension_numbers<[1], [0], [0], [1], [0, 0, 1, 1], [], []>} : vector<16x3xf32>, vector<3x2048xf32>, vector<16x2048xf32> -> vector<16x2048xf32>
    %237 = vector.broadcast %235 : vector<1x2048xf32> to vector<16x2048xf32>
    %238 = arith.addf %236, %237 : vector<16x2048xf32>
    %cst_59 = arith.constant 0.000000e+00 : f32
    %239 = vector.broadcast %cst_59 : f32 to vector<16x2048xf32>
    %240 = arith.maximumf %238, %239 : vector<16x2048xf32>
    %c1_60 = arith.constant 1 : index
    %c0_61 = arith.constant 0 : index
    %c0_62 = arith.constant 0 : index
    %241 = vector.load %arg4[%c1_60, %c0_61, %c0_62] : memref<2x3x2048xbf16, #tpu.memory_space<vmem>>, vector<1x3x2048xbf16>
    %242 = vector.shape_cast %241 : vector<1x3x2048xbf16> to vector<3x2048xbf16>
    %243 = arith.extf %242 : vector<3x2048xbf16> to vector<3x2048xf32>
    %cst_63 = arith.constant dense<0.000000e+00> : vector<16x3xf32>
    %244 = tpu.matmul %240, %243, %cst_63 {dimension_numbers = #tpu.dot_dimension_numbers<[1], [1], [0], [0], [0, 0, 1, 0], [], []>} : vector<16x2048xf32>, vector<3x2048xf32>, vector<16x3xf32> -> vector<16x3xf32>
    %245 = vector.broadcast %142 : vector<1x3xf32> to vector<16x3xf32>
    %246 = arith.addf %244, %245 : vector<16x3xf32>
    %247 = arith.addf %230, %246 : vector<16x3xf32>
    %cst_64 = arith.constant dense<0.000000e+00> : vector<16xf32>
    %248 = vector.multi_reduction <add>, %247, %cst_64 [1] : vector<16x3xf32> to vector<16xf32>
    %249 = vector.shape_cast %248 : vector<16xf32> to vector<16x1xf32>
    %cst_65 = arith.constant 3.000000e+00 : f32
    %250 = vector.broadcast %cst_65 : f32 to vector<16x1xf32>
    %251 = arith.divf %249, %250 : vector<16x1xf32>
    %252 = vector.broadcast %251 : vector<16x1xf32> to vector<16x3xf32>
    %253 = arith.subf %247, %252 : vector<16x3xf32>
    %254 = arith.mulf %253, %253 : vector<16x3xf32>
    %cst_66 = arith.constant dense<0.000000e+00> : vector<16xf32>
    %255 = vector.multi_reduction <add>, %254, %cst_66 [1] : vector<16x3xf32> to vector<16xf32>
    %256 = vector.shape_cast %255 : vector<16xf32> to vector<16x1xf32>
    %cst_67 = arith.constant 3.000000e+00 : f32
    %257 = vector.broadcast %cst_67 : f32 to vector<16x1xf32>
    %258 = arith.divf %256, %257 : vector<16x1xf32>
    %259 = vector.broadcast %251 : vector<16x1xf32> to vector<16x3xf32>
    %260 = arith.subf %247, %259 : vector<16x3xf32>
    %cst_68 = arith.constant 9.99999974E-6 : f32
    %261 = vector.broadcast %cst_68 : f32 to vector<16x1xf32>
    %262 = arith.addf %258, %261 : vector<16x1xf32>
    %263 = math.rsqrt %262 : vector<16x1xf32>
    %264 = vector.broadcast %263 : vector<16x1xf32> to vector<16x3xf32>
    %265 = arith.mulf %260, %264 : vector<16x3xf32>
    %266 = vector.broadcast %143 : vector<1x3xf32> to vector<16x3xf32>
    %267 = arith.mulf %265, %266 : vector<16x3xf32>
    %268 = vector.broadcast %144 : vector<1x3xf32> to vector<16x3xf32>
    %269 = arith.addf %267, %268 : vector<16x3xf32>
    %270 = vector.shape_cast %269 : vector<16x3xf32> to vector<2x8x3xf32>
    %cst_69 = arith.constant dense<0.000000e+00> : vector<2x3xf32>
    %271 = vector.multi_reduction <add>, %270, %cst_69 [1] : vector<2x8x3xf32> to vector<2x3xf32>
    %cst_70 = arith.constant 8.000000e+00 : f32
    %272 = vector.broadcast %cst_70 : f32 to vector<2x3xf32>
    %273 = arith.divf %271, %272 : vector<2x3xf32>
    %c26 = arith.constant 26 : index
    %c0_71 = arith.constant 0 : index
    %274 = vector.load %arg2[%c26, %c0_71] : memref<32x128xf32, #tpu.memory_space<vmem>>, vector<3x2xf32>
    %c29 = arith.constant 29 : index
    %c0_72 = arith.constant 0 : index
    %275 = vector.load %arg2[%c29, %c0_72] : memref<32x128xf32, #tpu.memory_space<vmem>>, vector<1x2xf32>
    %276 = vector.extract_strided_slice %273 {offsets = [0, 0], sizes = [2, 1], strides = [1, 1]} : vector<2x3xf32> to vector<2x1xf32>
    %277 = vector.extract_strided_slice %274 {offsets = [0, 0], sizes = [1, 2], strides = [1, 1]} : vector<3x2xf32> to vector<1x2xf32>
    %278 = vector.broadcast %276 : vector<2x1xf32> to vector<2x2xf32>
    %279 = vector.broadcast %277 : vector<1x2xf32> to vector<2x2xf32>
    %280 = arith.mulf %278, %279 : vector<2x2xf32>
    %281 = vector.extract_strided_slice %273 {offsets = [0, 1], sizes = [2, 1], strides = [1, 1]} : vector<2x3xf32> to vector<2x1xf32>
    %282 = vector.extract_strided_slice %274 {offsets = [1, 0], sizes = [1, 2], strides = [1, 1]} : vector<3x2xf32> to vector<1x2xf32>
    %283 = vector.broadcast %281 : vector<2x1xf32> to vector<2x2xf32>
    %284 = vector.broadcast %282 : vector<1x2xf32> to vector<2x2xf32>
    %285 = arith.mulf %283, %284 : vector<2x2xf32>
    %286 = arith.addf %280, %285 : vector<2x2xf32>
    %287 = vector.extract_strided_slice %273 {offsets = [0, 2], sizes = [2, 1], strides = [1, 1]} : vector<2x3xf32> to vector<2x1xf32>
    %288 = vector.extract_strided_slice %274 {offsets = [2, 0], sizes = [1, 2], strides = [1, 1]} : vector<3x2xf32> to vector<1x2xf32>
    %289 = vector.broadcast %287 : vector<2x1xf32> to vector<2x2xf32>
    %290 = vector.broadcast %288 : vector<1x2xf32> to vector<2x2xf32>
    %291 = arith.mulf %289, %290 : vector<2x2xf32>
    %292 = arith.addf %286, %291 : vector<2x2xf32>
    %293 = vector.broadcast %275 : vector<1x2xf32> to vector<2x2xf32>
    %294 = arith.addf %292, %293 : vector<2x2xf32>
    %cst_73 = arith.constant 0.000000e+00 : f32
    %295 = vector.broadcast %cst_73 : f32 to vector<2x1x128xf32>
    %c0_74 = arith.constant 0 : index
    %c0_75 = arith.constant 0 : index
    %c0_76 = arith.constant 0 : index
    %296 = vector.load %arg5[%c0_74, %c0_75, %c0_76] : memref<2x1x128xf32, #tpu.memory_space<vmem>>, vector<2x1x128xf32>
    tpu.vector_store %arg5[%c0_74, %c0_75, %c0_76], %295 {strides = array<i32>} : memref<2x1x128xf32, #tpu.memory_space<vmem>>, vector<2x1x128xf32>,
    %297 = vector.shape_cast %294 : vector<2x2xf32> to vector<2x1x2xf32>
    %c0_77 = arith.constant 0 : index
    %c0_78 = arith.constant 0 : index
    %c0_79 = arith.constant 0 : index
    %298 = vector.load %arg5[%c0_77, %c0_78, %c0_79] : memref<2x1x128xf32, #tpu.memory_space<vmem>>, vector<2x1x2xf32>
    tpu.vector_store %arg5[%c0_77, %c0_78, %c0_79], %297 {strides = array<i32>} : memref<2x1x128xf32, #tpu.memory_space<vmem>>, vector<2x1x2xf32>,
    return
  }
  func.func @transform_0(%arg0: i32) -> (i32, i32, i32) {
    %c0_i32 = arith.constant 0 : i32
    %c0_i32_0 = arith.constant 0 : i32
    %c0_i32_1 = arith.constant 0 : i32
    return %arg0, %c0_i32, %c0_i32_0 : i32, i32, i32
  }
  func.func @transform_1(%arg0: i32) -> (i32, i32) {
    %c0_i32 = arith.constant 0 : i32
    %c0_i32_0 = arith.constant 0 : i32
    %c0_i32_1 = arith.constant 0 : i32
    return %c0_i32, %c0_i32_0 : i32, i32
  }
  func.func @transform_2(%arg0: i32) -> (i32, i32, i32) {
    %c0_i32 = arith.constant 0 : i32
    %c0_i32_0 = arith.constant 0 : i32
    %c0_i32_1 = arith.constant 0 : i32
    %c0_i32_2 = arith.constant 0 : i32
    return %c0_i32, %c0_i32_0, %c0_i32_1 : i32, i32, i32
  }
  func.func @transform_3(%arg0: i32) -> (i32, i32, i32) {
    %c0_i32 = arith.constant 0 : i32
    %c0_i32_0 = arith.constant 0 : i32
    %c0_i32_1 = arith.constant 0 : i32
    %c0_i32_2 = arith.constant 0 : i32
    return %c0_i32, %c0_i32_0, %c0_i32_1 : i32, i32, i32
  }
  func.func @transform_4(%arg0: i32) -> (i32, i32, i32) {
    %c0_i32 = arith.constant 0 : i32
    %c0_i32_0 = arith.constant 0 : i32
    %c0_i32_1 = arith.constant 0 : i32
    return %arg0, %c0_i32, %c0_i32_0 : i32, i32, i32
  }
}

</mosaic_0001>

<bundles_post_ra>
// kernel: tpu_custom_call.1
= control target key start
LH: loop header
LB: loop body
LE: loop exit
PB: predicated region body
PF: predicated region fallthrough
CT: control target
= control target key end

     0   :  { %v4430_v1 = vmov 2   ;;  %v4431_v2 = vmov 0   ;;  %s5095_s0 = inlined_call_operand.vmem [shape: f32[2,8,3], index: 0, kind: input, shape index: {}]   ;;  %s5096_s1 = inlined_call_operand.vmem [shape: f32[32,128], index: 1, kind: input, shape index: {}]   ;;  %s5097_s2 = inlined_call_operand.vmem [shape: bf16[2,4,2048], index: 2, kind: input, shape index: {}]   ;;  %s5098_s3 = inlined_call_operand.vmem [shape: bf16[2,3,2048], index: 3, kind: input, shape index: {}]   ;;  %s5099_s4 = inlined_call_operand.hbm [shape: f32[2,1,128], index: 4, kind: output, shape index: {}]  }
   0x1   :  { %v4468_v0 = vld [vmem:[%s5095_s0] sm:$0xff]  ;;  %4349 = vset.pattern.permute.xlu1 %v4430_v1  ;;  %4347 = vset.pattern.permute.xlu0 %v4431_v2 }
   0x2   :  { %9 = vsyncpa [#allocation3], 0  ;;  %62 = vperm.xlu1 %4349, %v4468_v0   ;;  %31 = vperm.xlu0 %4347, %v4468_v0   ;;  %v4477_v3 = vld [vmem:[%s5095_s0 + $0x8] sm:$0xff]  ;;  %v4432_v4 = vmov 1   ;;  %v4433_v5 = vmov 0.0   ;;  %v39_v6 = vlaneseq  ;;  %vm4434_vm0 = vmmov 0  }
   0x3   :  { %4297 = vmatprep.subr.mxu0 %v4433_v5  ;;  %4161 = vst [vmem:[#allocation2] sm:$0x1] %v4433_v5  ;;  %4162 = vst [vmem:[#allocation2 + $0x1] sm:$0x1] %v4433_v5  ;;  %4302 = vmatprep.subr.mxu1 %v4433_v5  ;;  %v20_v10 = vld [vmem:[%s5096_s1] sm:$0x7] }
   0x4   :  { %v4492_v7 = vshrl.u32 %v39_v6, 7  ;;  %4299 = vmatprep.mubr.msk.f32.mxu0 %vm4434_vm0, %v4433_v5  ;;  %4304 = vmatprep.mubr.msk.f32.mxu1 %vm4434_vm0, %v4433_v5  ;;  %v4182_v24 = vld [vmem:[%s5096_s1 + $0x3] ss:$0 sm:$0xff]  ;;  %s4435_s22 = smov 125   ;;  %vm86_vm1 = vcmask 23552   ;;  %vm240_vm2 = vcmask 64512  }
   0x5   :  { %s4436_s23 = smov 122   ;;  %vm694_vm3 = vcmask 1042432   ;;  %vm4163_vm4 = vcmask 8192   ;;  %s4437_s10 = smov [#allocation2]  }
   0x6   :  { %4350 = vset.pattern.permute.xlu1 %v4431_v2  ;;  %4348 = vset.pattern.permute.xlu0 %v4432_v4  ;;  %v4495_v8 = vsub.s32 0, %v4492_v7  ;;  %v4498_v9 = vsub.s32 1, %v4492_v7  ;;  %v4504_v12 = vsub.s32 2, %v4492_v7  ;;  %s4171_s11 = sshll.u32 %s4437_s10, 4  ;;  %s4172_s11 = int_to_ptr.vmem [resolvable:$true] %s4171_s11 }
   0x7   :  { %36 = vperm.xlu1 %4350, %v4477_v3   ;;  %46 = vperm.xlu0 %4348, %v4468_v0   ;;  %s4408_s12 = scalar_lea.vmem %s4172_s11, 32  ;;  %p4413_p1 = scmp.lt.s32.totalorder %s4172_s11, %s4172_s11 }
   0x8   :  { %v42_v14 = vrot.slane %v20_v10, %v4495_v8  ;;  %v56_v15 = vrot.slane %v20_v10, %v4498_v9  ;;  %v72_v16 = vrot.slane %v20_v10, %v4504_v12  ;;  %p4409_p0 = scmp.ne.s32.totalorder %s4172_s11, %s4408_s12  ;;  %p4414_p2 = scmp.lt.s32.totalorder %s4408_s12, %s4408_s12 }
   0xa   :  { %p4415_p3 = por %p4414_p2, %p4413_p1 }
   0xb   :  { %4351 = vset.pattern.permute.xlu1 %v4432_v4  ;;  %4352 = vset.pattern.permute.xlu0 %v4430_v1 }
   0xc   :  { %50 = vperm.xlu1 %4351, %v4477_v3   ;;  %66 = vperm.xlu0 %4352, %v4477_v3   ;;  %p4416_p4 = pnand %p4415_p3, %p4409_p0 }
  0x10   :  { %4353 = vset.pattern.permute.xlu1 %v4431_v2 }
  0x7d   :  { %v32_v11 = vpop.permute.xlu0 %31  ;;  %v63_v13 = vpop.permute.xlu1 %62 }
  0x7e   :  { %v43_v19 = vmul.f32 %v42_v14, %v32_v11  ;;  %v73_v21 = vmul.f32 %v72_v16, %v63_v13 }
  0x82   :  { %v47_v17 = vpop.permute.xlu0 %46  ;;  %v37_v18 = vpop.permute.xlu1 %36 }
  0x83   :  { %v57_v20 = vmul.f32 %v56_v15, %v47_v17  ;;  %v44_v23 = vmul.f32 %v42_v14, %v37_v18  ;;  %v22_v18 = vld [vmem:[%s5096_s1 + $0x4] sm:$0x7] }
  0x85   :  { %v59_v22 = vadd.f32 %v57_v20, %v43_v19  ;;  %v434_v20 = vrot.slane %v22_v18, %v4495_v8 }
  0x87   :  { %v75_v25 = vadd.f32 %v73_v21, %v59_v22  ;;  %v51_v26 = vpop.permute.xlu1 %50  ;;  %v67_v27 = vpop.permute.xlu0 %66  ;;  %v448_v21 = vrot.slane %v22_v18, %v4498_v9  ;;  %v464_v22 = vrot.slane %v22_v18, %v4504_v12 }
  0x88   :  { %v58_v28 = vmul.f32 %v56_v15, %v51_v26  ;;  %v74_v29 = vmul.f32 %v72_v16, %v67_v27 }
  0x89   :  { %v81_v30 = vadd.f32 %v4182_v24, %v75_v25 }
  0x8a   :  { %v60_v31 = vadd.f32 %v58_v28, %v44_v23 }
  0x8b   :  { %84 = vrot.lane.b32.xlu1 %v81_v30, %s4435_s22 }
  0x8c   :  { %v76_v32 = vadd.f32 %v74_v29, %v60_v31  ;;  %v4189_v29 = vld [vmem:[%s5096_s1 + $0x7] ss:$0 sm:$0xff] }
  0x8e   :  { %v82_v33 = vadd.f32 %v4182_v24, %v76_v32 }
  0x90   :  { %162 = vrot.lane.b32.xlu1 %v82_v33, %s4435_s22 }
  0xfd   :  { %v85_v34 = vpop.permute.xlu1 %84 }
  0xfe   :  { %4298 = vmatpush3.xpose.msk.msra.mxu0 %vm86_vm1, %v85_v34 }
  0xff   :  { %4307 = vmatprep.subr.mxu0 %v4433_v5 }
 0x101   :  { %4300 = vmatmul.mubr.msk.f32.vlgmr.msra.gmra.mxu0 %vm86_vm1, %v81_v30 }
 0x102   :  { %v163_v35 = vpop.permute.xlu1 %162  ;;  %4309 = vmatprep.mubr.msk.f32.mxu0 %vm4434_vm0, %v4433_v5 }
 0x103   :  { %4303 = vmatpush3.xpose.msk.msra.mxu1 %vm86_vm1, %v163_v35 }
 0x104   :  { %4312 = vmatprep.subr.mxu1 %v4433_v5 }
 0x106   :  { %4305 = vmatmul.mubr.msk.f32.vlgmr.msra.gmra.mxu1 %vm86_vm1, %v82_v33 }
 0x107   :  { %4314 = vmatprep.mubr.msk.f32.mxu1 %vm4434_vm0, %v4433_v5 }
 0x1c1   :  { %v157_v36 = vpop.f32.mrf.mxu0 }
 0x1c2   :  { %v238_v37 = vmul.f32 0.57735026, %v157_v36 }
 0x1c3   :  { %v4301_v38 = vpop.f32.mrf.mxu0 }
 0x1c4   :  { %v241_v39 = vsel %vm240_vm2, %v238_v37, -inf }
 0x1c5   :  { %242 = vmax.xlane.f32.xlu0 %v241_v39 }
 0x1c6   :  { %v234_v40 = vpop.f32.mrf.mxu1 }
 0x1c7   :  { %v239_v41 = vmul.f32 0.57735026, %v234_v40 }
 0x1c8   :  { %v4306_v42 = vpop.f32.mrf.mxu1 }
 0x1c9   :  { %v244_v43 = vsel %vm240_vm2, %v239_v41, -inf }
 0x1ca   :  { %245 = vmax.xlane.f32.xlu1 %v244_v43 }
 0x1db   :  { %269 = vrot.lane.b32.xlu1 %v81_v30, %s4436_s23 }
 0x24e   :  { %v243_v44 = vpop.xlane.xlu0 %242 }
 0x24f   :  { %v247_v45 = vsub.f32 %v238_v37, %v243_v44 }
 0x251   :  { %v249_v46 = vmul.f32 1.442695, %v247_v45 }
 0x253   :  { %4376 = vpow2.f32 %v249_v46  ;;  %v246_v47 = vpop.xlane.xlu1 %245 }
 0x254   :  { %v248_v48 = vsub.f32 %v239_v41, %v246_v47 }
 0x256   :  { %v251_v49 = vmul.f32 1.442695, %v248_v48 }
 0x257   :  { %v270_v50 = vpop.permute.xlu1 %269 }
 0x258   :  { %4378 = vpow2.f32 %v251_v49  ;;  %4308 = vmatpush3.msra.mxu0 %v270_v50 }
 0x260   :  { %v4377_v51 = vpop.eup %4376 }
 0x261   :  { %v253_v52 = vsel %vm240_vm2, %v4377_v51, 0.0 }
 0x262   :  { %254 = vadd.xlane.f32.xlu0 %v253_v52 }
 0x265   :  { %v4379_v53 = vpop.eup %4378 }
 0x266   :  { %v256_v54 = vsel %vm240_vm2, %v4379_v53, 0.0 }
 0x267   :  { %257 = vadd.xlane.f32.xlu0 %v256_v54 }
 0x27d   :  { %345 = vrot.lane.b32.xlu0 %v82_v33, %s4436_s23 }
 0x2eb   :  { %v255_v55 = vpop.xlane.xlu0 %254 }
 0x2ec   :  { %4380 = vrcp.f32 %v255_v55 }
 0x2f0   :  { %v258_v56 = vpop.xlane.xlu0 %257 }
 0x2f1   :  { %4382 = vrcp.f32 %v258_v56 }
 0x2f4   :  { %v346_v57 = vpop.permute.xlu0 %345 }
 0x2f5   :  { %4313 = vmatpush3.msra.mxu1 %v346_v57 }
 0x2f9   :  { %v4381_v58 = vpop.eup %4380 }
 0x2fa   :  { %v261_v59 = vmul.f32 %v4381_v58, %v255_v55 }
 0x2fc   :  { %v263_v60 = vsub.f32 2.0, %v261_v59 }
 0x2fe   :  { %v4383_v61 = vpop.eup %4382  ;;  %v265_v62 = vmul.f32 %v4381_v58, %v263_v60  ;;  %v517_v58 = vld [vmem:[%s5097_s2 + $0x8] sm:$0xff] }
 0x2ff   :  { %v262_v63 = vmul.f32 %v4383_v61, %v258_v56  ;;  %v4579_v59 = vunpack.c.l.bf16 %v517_v58  ;;  %v4581_v60 = vunpack.c.h.bf16 %v517_v58 }
 0x300   :  { %v267_v6 = vmul.f32 %v4377_v51, %v265_v62 }
 0x301   :  { %v264_v10 = vsub.f32 2.0, %v262_v63  ;;  %v683_v62 = vcombine.high %v4581_v60, %v4581_v60 }
 0x302   :  { %4310 = vmatmul.mubr.msk.f32.vlgmr.msra.gmra.mxu0 %vm240_vm2, %v267_v6 }
 0x303   :  { %v266_v11 = vmul.f32 %v4383_v61, %v264_v10  ;;  %791 = vmatprep.mubr.f32.mxu0 %v4433_v5  ;;  %v682_v61 = vcombine.high %v4579_v59, %v4579_v59 }
 0x305   :  { %v268_v13 = vmul.f32 %v4379_v53, %v266_v11 }
 0x307   :  { %4315 = vmatmul.mubr.msk.f32.vlgmr.msra.gmra.mxu1 %vm240_vm2, %v268_v13 }
 0x308   :  { %868 = vmatprep.mubr.f32.mxu1 %v4433_v5 }
 0x3c2   :  { %v341_v14 = vpop.f32.mrf.mxu0 }
 0x3c3   :  { %454 = vperm.xlu0 %4352, %v341_v14   ;;  %423 = vperm.xlu1 %4353, %v341_v14  }
 0x3c4   :  { %v4311_v15 = vpop.f32.mrf.mxu0 }
 0x3c5   :  { %v518_v15 = vld [vmem:[%s5097_s2 + $0x10] sm:$0xff] }
 0x3c7   :  { %4356 = vset.pattern.permute.xlu0 %v4432_v4  ;;  %4354 = vset.pattern.permute.xlu1 %v4432_v4  ;;  %v417_v16 = vpop.f32.mrf.mxu1 }
 0x3c8   :  { %438 = vperm.xlu1 %4354, %v341_v14   ;;  %442 = vperm.xlu0 %4356, %v417_v16  }
 0x3c9   :  { %v4316_v17 = vpop.f32.mrf.mxu1 }
 0x3ca   :  { %v4190_v17 = vld [vmem:[%s5096_s1 + $0x8] ss:$0 sm:$0xff] }
 0x3cc   :  { %4355 = vset.pattern.permute.xlu1 %v4431_v2  ;;  %4358 = vset.pattern.permute.xlu0 %v4431_v2 }
 0x3cd   :  { %428 = vperm.xlu1 %4355, %v417_v16  }
 0x3d1   :  { %4357 = vset.pattern.permute.xlu1 %v4430_v1 }
 0x3d2   :  { %458 = vperm.xlu1 %4357, %v417_v16  }
 0x3d6   :  { %4359 = vset.pattern.permute.xlu1 %v4432_v4 }
 0x43e   :  { %v424_v19 = vpop.permute.xlu1 %423  ;;  %v455_v23 = vpop.permute.xlu0 %454 }
 0x43f   :  { %v435_v25 = vmul.f32 %v434_v20, %v424_v19  ;;  %v465_v27 = vmul.f32 %v464_v22, %v455_v23  ;;  %v4191_v19 = vld [vmem:[%s5096_s1 + $0x9] ss:$0 sm:$0xff] }
 0x443   :  { %v439_v24 = vpop.permute.xlu1 %438  ;;  %v443_v32 = vpop.permute.xlu0 %442 }
 0x444   :  { %v449_v26 = vmul.f32 %v448_v21, %v439_v24  ;;  %v450_v35 = vmul.f32 %v448_v21, %v443_v32  ;;  %v4600_v21 = vunpack.c.h.bf16 %v518_v15 }
 0x446   :  { %v451_v28 = vadd.f32 %v449_v26, %v435_v25  ;;  %v685_v25 = vcombine.high %v4600_v21, %v4600_v21 }
 0x448   :  { %v467_v30 = vadd.f32 %v465_v27, %v451_v28  ;;  %v429_v31 = vpop.permute.xlu1 %428 }
 0x449   :  { %v436_v33 = vmul.f32 %v434_v20, %v429_v31  ;;  %v4598_v20 = vunpack.c.l.bf16 %v518_v15 }
 0x44a   :  { %v473_v34 = vadd.f32 %v4189_v29, %v467_v30 }
 0x44b   :  { %v452_v38 = vadd.f32 %v450_v35, %v436_v33  ;;  %v684_v24 = vcombine.high %v4598_v20, %v4598_v20  ;;  %v1375_v35 = vld [vmem:[%s5098_s3] sm:$0xff] }
 0x44c   :  { %v475_v36 = vadd.f32 %v473_v34, %v4468_v0 }
 0x44d   :  { %v459_v37 = vpop.permute.xlu1 %458 }
 0x44e   :  { %v466_v39 = vmul.f32 %v464_v22, %v459_v37  ;;  %v477_v40 = vsel %vm86_vm1, %v475_v36, 0.0  ;;  %v1380_v37 = vunpack.c.h.bf16 %v1375_v35 }
 0x44f   :  { %478 = vadd.xlane.f32.xlu1 %v477_v40  ;;  %v1376_v40 = vld [vmem:[%s5098_s3 + $0x8] sm:$0xff] }
 0x450   :  { %v468_v41 = vadd.f32 %v466_v39, %v452_v38  ;;  %v1400_v39 = vcombine.high %v1380_v37, %v1380_v37 }
 0x452   :  { %v474_v42 = vadd.f32 %v4189_v29, %v468_v41  ;;  %v519_v29 = vld [vmem:[%s5097_s2 + $0x18] sm:$0xff]  ;;  %v1381_v41 = vunpack.c.l.bf16 %v1376_v40 }
 0x453   :  { %v4625_v31 = vunpack.c.l.bf16 %v519_v29  ;;  %v4627_v32 = vunpack.c.h.bf16 %v519_v29 }
 0x454   :  { %v476_v43 = vadd.f32 %v474_v42, %v4477_v3  ;;  %v516_v3 = vld [vmem:[%s5097_s2] sm:$0xff]  ;;  %v1382_v42 = vunpack.c.h.bf16 %v1376_v40 }
 0x455   :  { %v4562_v54 = vunpack.c.l.bf16 %v516_v3  ;;  %v4564_v55 = vunpack.c.h.bf16 %v516_v3  ;;  %v686_v33 = vcombine.high %v4625_v31, %v4625_v31  ;;  %v687_v34 = vcombine.high %v4627_v32, %v4627_v32 }
 0x456   :  { %v480_v44 = vsel %vm86_vm1, %v476_v43, 0.0 }
 0x457   :  { %481 = vadd.xlane.f32.xlu0 %v480_v44  ;;  %v680_v56 = vcombine.high %v4562_v54, %v4562_v54  ;;  %v681_v57 = vcombine.high %v4564_v55, %v4564_v55  ;;  %v1402_v44 = vcombine.high %v1382_v42, %v1382_v42 }
 0x459   :  { %4192 = vmatprep.subr.msk.mxu0 %vm694_vm3, %v680_v56  ;;  %4196 = vmatprep.subr.msk.mxu1 %vm694_vm3, %v681_v57 }
 0x45a   :  { %4193 = vmatpush1.msk.msra.mxu0 %vm694_vm3, %v4562_v54  ;;  %4197 = vmatpush1.msk.msra.mxu1 %vm694_vm3, %v4564_v55 }
 0x45b   :  { %4200 = vmatprep.subr.msk.mxu0 %vm694_vm3, %v682_v61  ;;  %4204 = vmatprep.subr.msk.mxu1 %vm694_vm3, %v683_v62 }
 0x4d8   :  { %v479_v45 = vpop.xlane.xlu1 %478 }
 0x4d9   :  { %v484_v46 = vmul.f32 0.33333334, %v479_v45  ;;  %v4690_v45 = vsub.s32 3, %v4492_v7 }
 0x4db   :  { %v486_v47 = vsub.f32 %v475_v36, %v484_v46  ;;  %v1379_v36 = vunpack.c.l.bf16 %v1375_v35  ;;  %v4693_v46 = vsub.s32 7, %v4492_v7  ;;  %v571_v40 = vrot.slane %v4598_v20, %v4690_v45 }
 0x4dd   :  { %v488_v48 = vmul.f32 %v486_v47, %v486_v47  ;;  %v1399_v38 = vcombine.high %v1379_v36, %v1379_v36 }
 0x4df   :  { %v490_v49 = vsel %vm86_vm1, %v488_v48, 0.0  ;;  %v547_v48 = vrot.slane %v4564_v55, %v4690_v45 }
 0x4e0   :  { %491 = vadd.xlane.f32.xlu0 %v490_v49  ;;  %v482_v0 = vpop.xlane.xlu0 %481  ;;  %v543_v49 = vrot.slane %v4562_v54, %v4693_v46 }
 0x4e1   :  { %v485_v50 = vmul.f32 0.33333334, %v482_v0  ;;  %v551_v0 = vrot.slane %v4564_v55, %v4693_v46 }
 0x4e3   :  { %v487_v51 = vsub.f32 %v476_v43, %v485_v50  ;;  %v1401_v43 = vcombine.high %v1381_v41, %v1381_v41  ;;  %v631_v7 = vrot.slane %v551_v0, %v4690_v45 }
 0x4e5   :  { %v489_v52 = vmul.f32 %v487_v51, %v487_v51 }
 0x4e7   :  { %v493_v53 = vsel %vm86_vm1, %v489_v52, 0.0  ;;  %v623_v52 = vrot.slane %v543_v49, %v4690_v45 }
 0x4e8   :  { %494 = vadd.xlane.f32.xlu1 %v493_v53  ;;  %v1377_v53 = vld [vmem:[%s5098_s3 + $0x10] sm:$0xff] }
 0x4e9   :  { %v4710_v62 = vunpack.c.l.bf16 %v1377_v53  ;;  %v4712_v55 = vunpack.c.h.bf16 %v1377_v53 }
 0x569   :  { %v492_v63 = vpop.xlane.xlu0 %491 }
 0x56a   :  { %v496_v6 = vmul.f32 0.33333334, %v492_v63 }
 0x56c   :  { %v498_v10 = vadd.f32 1e-05, %v496_v6 }
 0x56e   :  { %4384 = vrsqrt.f32 %v498_v10 }
 0x571   :  { %v495_v11 = vpop.xlane.xlu1 %494 }
 0x572   :  { %v497_v13 = vmul.f32 0.33333334, %v495_v11 }
 0x574   :  { %v499_v14 = vadd.f32 1e-05, %v497_v13  ;;  %v555_v13 = vrot.slane %v4579_v59, %v4690_v45 }
 0x576   :  { %4386 = vrsqrt.f32 %v499_v14  ;;  %v563_v14 = vrot.slane %v4581_v60, %v4690_v45 }
 0x57b   :  { %v4385_v16 = vpop.eup %4384 }
 0x57c   :  { %v502_v18 = vmul.f32 %v4385_v16, %v486_v47  ;;  %v539_v47 = vrot.slane %v4562_v54, %v4690_v45 }
 0x57e   :  { %v508_v22 = vmul.f32 %v4190_v17, %v502_v18  ;;  %v619_v50 = vrot.slane %v539_v47, %v4690_v45  ;;  %v1404_v18 = vcombine.high %v4712_v55, %v4712_v55 }
 0x580   :  { %v4602_v23 = vadd.f32 %v4191_v19, %v508_v22  ;;  %v567_v22 = vrot.slane %v4581_v60, %v4693_v46 }
 0x582   :  { %4194 = vmatmul.mubr.msk.f32.vlgmr.msra.gmra.mxu0 %vm86_vm1, %v4602_v23  ;;  %4198 = vmatmul.mubr.msk.f32.vlgmr.msra.gmra.mxu1 %vm86_vm1, %v4602_v23 }
 0x583   :  { %v4387_v26 = vpop.eup %4386  ;;  %797 = vmatprep.mubr.f32.mxu0 %v4433_v5  ;;  %874 = vmatprep.mubr.f32.mxu1 %v4433_v5 }
 0x584   :  { %v503_v27 = vmul.f32 %v4387_v26, %v487_v51  ;;  %4201 = vmatpush1.msk.msra.mxu0 %vm694_vm3, %v4579_v59  ;;  %4205 = vmatpush1.msk.msra.mxu1 %vm694_vm3, %v4581_v60  ;;  %v627_v51 = vrot.slane %v547_v48, %v4690_v45  ;;  %v635_v26 = vrot.slane %v555_v13, %v4690_v45 }
 0x585   :  { %4208 = vmatprep.subr.msk.mxu0 %vm694_vm3, %v684_v24  ;;  %4212 = vmatprep.subr.msk.mxu1 %vm694_vm3, %v685_v25 }
 0x586   :  { %v509_v28 = vmul.f32 %v4190_v17, %v503_v27  ;;  %v1403_v17 = vcombine.high %v4710_v62, %v4710_v62 }
 0x588   :  { %v4623_v30 = vadd.f32 %v4191_v19, %v509_v28  ;;  %v559_v19 = vrot.slane %v4579_v59, %v4693_v46  ;;  %v1378_v59 = vld [vmem:[%s5098_s3 + $0x18] sm:$0xff] }
 0x589   :  { %v4739_v47 = vunpack.c.l.bf16 %v1378_v59  ;;  %v4741_v48 = vunpack.c.h.bf16 %v1378_v59 }
 0x58a   :  { %4195 = vmatmul.mubr.msk.f32.gmra.mxu0 %vm86_vm1, %v4623_v30  ;;  %4199 = vmatmul.mubr.msk.f32.gmra.mxu1 %vm86_vm1, %v4623_v30 }
 0x58b   :  { %945 = vmatprep.mubr.f32.mxu0 %v4433_v5  ;;  %1022 = vmatprep.mubr.f32.mxu1 %v4433_v5 }
 0x58e   :  { %4202 = vmatmul.mubr.msk.f32.vlgmr.msra.gmra.mxu0 %vm86_vm1, %v4602_v23  ;;  %4206 = vmatmul.mubr.msk.f32.vlgmr.msra.gmra.mxu1 %vm86_vm1, %v4602_v23 }
 0x58f   :  { %951 = vmatprep.mubr.f32.mxu0 %v4433_v5  ;;  %1028 = vmatprep.mubr.f32.mxu1 %v4433_v5 }
 0x590   :  { %4209 = vmatpush1.msk.msra.mxu0 %vm694_vm3, %v4598_v20  ;;  %4213 = vmatpush1.msk.msra.mxu1 %vm694_vm3, %v4600_v21 }
 0x591   :  { %4216 = vmatprep.subr.msk.mxu0 %vm694_vm3, %v686_v33  ;;  %4220 = vmatprep.subr.msk.mxu1 %vm694_vm3, %v687_v34  ;;  %v643_v34 = vrot.slane %v563_v14, %v4690_v45 }
 0x592   :  { %4203 = vmatmul.mubr.msk.f32.gmra.mxu0 %vm86_vm1, %v4623_v30  ;;  %4207 = vmatmul.mubr.msk.f32.gmra.mxu1 %vm86_vm1, %v4623_v30 }
 0x593   :  { %1099 = vmatprep.mubr.f32.mxu0 %v4433_v5  ;;  %1176 = vmatprep.mubr.f32.mxu1 %v4433_v5 }
 0x596   :  { %4210 = vmatmul.mubr.msk.f32.vlgmr.msra.gmra.mxu0 %vm86_vm1, %v4602_v23  ;;  %4214 = vmatmul.mubr.msk.f32.vlgmr.msra.gmra.mxu1 %vm86_vm1, %v4602_v23 }
 0x597   :  { %1105 = vmatprep.mubr.f32.mxu0 %v4433_v5  ;;  %1182 = vmatprep.mubr.f32.mxu1 %v4433_v5 }
 0x598   :  { %4217 = vmatpush1.msk.msra.mxu0 %vm694_vm3, %v4625_v31  ;;  %4221 = vmatpush1.msk.msra.mxu1 %vm694_vm3, %v4627_v32 }
 0x599   :  { %1445 = vmatprep.subr.mxu0 %v1399_v38  ;;  %1520 = vmatprep.subr.mxu1 %v1400_v39 }
 0x59a   :  { %4211 = vmatmul.mubr.msk.f32.gmra.mxu0 %vm86_vm1, %v4623_v30  ;;  %4215 = vmatmul.mubr.msk.f32.gmra.mxu1 %vm86_vm1, %v4623_v30 }
 0x59b   :  { %1253 = vmatprep.mubr.f32.mxu0 %v4433_v5  ;;  %1330 = vmatprep.mubr.f32.mxu1 %v4433_v5 }
 0x59e   :  { %4218 = vmatmul.mubr.msk.f32.vlgmr.msra.gmra.mxu0 %vm86_vm1, %v4602_v23  ;;  %4222 = vmatmul.mubr.msk.f32.vlgmr.msra.gmra.mxu1 %vm86_vm1, %v4602_v23 }
 0x59f   :  { %1259 = vmatprep.mubr.f32.mxu0 %v4433_v5  ;;  %1336 = vmatprep.mubr.f32.mxu1 %v4433_v5 }
 0x5a0   :  { %1446 = vmatpush1.xpose.msra.mxu0 %v1379_v36  ;;  %1521 = vmatpush1.xpose.msra.mxu1 %v1380_v37  ;;  %v639_v36 = vrot.slane %v559_v19, %v4690_v45  ;;  %v647_v37 = vrot.slane %v567_v22, %v4690_v45 }
 0x5a1   :  { %1595 = vmatprep.subr.mxu0 %v1401_v43  ;;  %1670 = vmatprep.subr.mxu1 %v1402_v44 }
 0x5a2   :  { %4219 = vmatmul.mubr.msk.f32.gmra.mxu0 %vm86_vm1, %v4623_v30  ;;  %4223 = vmatmul.mubr.msk.f32.gmra.mxu1 %vm86_vm1, %v4623_v30 }
 0x642   :  { %v793_v3 = vpop.f32.mrf.mxu0  ;;  %v870_v56 = vpop.f32.mrf.mxu1 }
 0x643   :  { %v794_v57 = vadd.f32 %v793_v3, %v619_v50  ;;  %v871_v58 = vadd.f32 %v870_v56, %v627_v51  ;;  %v583_v56 = vrot.slane %v4600_v21, %v4693_v46 }
 0x644   :  { %v795_v54 = vpop.f32.mrf.mxu0  ;;  %v872_v61 = vpop.f32.mrf.mxu1 }
 0x645   :  { %v796_v63 = vadd.f32 %v795_v54, %v623_v52  ;;  %v873_v6 = vadd.f32 %v872_v61, %v631_v7  ;;  %v1343_v15 = vmax.f32 %v794_v57, 0.0  ;;  %v1345_v16 = vmax.f32 %v871_v58, 0.0 }
 0x646   :  { %v651_v58 = vrot.slane %v571_v40, %v4690_v45  ;;  %v663_v22 = vrot.slane %v583_v56, %v4690_v45 }
 0x647   :  { %v1344_v10 = vmax.f32 %v796_v63, 0.0  ;;  %v1346_v11 = vmax.f32 %v873_v6, 0.0 }
 0x649   :  { %1479 = vmatprep.mubr.f32.mxu0 %v1344_v10  ;;  %1554 = vmatprep.mubr.f32.mxu1 %v1346_v11  ;;  %v1405_v10 = vcombine.high %v4739_v47, %v4739_v47  ;;  %v1406_v11 = vcombine.high %v4741_v48, %v4741_v48 }
 0x64a   :  { %v799_v24 = vpop.f32.mrf.mxu0  ;;  %v876_v25 = vpop.f32.mrf.mxu1  ;;  %1480 = vmatmul.mubr.f32.vlgmr.msra.gmra.mxu0 %v1343_v15  ;;  %1555 = vmatmul.mubr.f32.vlgmr.msra.gmra.mxu1 %v1345_v16 }
 0x64b   :  { %1596 = vmatpush1.xpose.msra.mxu0 %v1381_v41  ;;  %1671 = vmatpush1.xpose.msra.mxu1 %v1382_v42  ;;  %v800_v27 = vadd.f32 %v799_v24, %v619_v50  ;;  %v877_v28 = vadd.f32 %v876_v25, %v627_v51  ;;  %v579_v41 = vrot.slane %v4600_v21, %v4690_v45 }
 0x64c   :  { %v801_v29 = vpop.f32.mrf.mxu0  ;;  %v878_v33 = vpop.f32.mrf.mxu1  ;;  %1745 = vmatprep.subr.mxu0 %v1403_v17  ;;  %1820 = vmatprep.subr.mxu1 %v1404_v18  ;;  %v575_v42 = vrot.slane %v4598_v20, %v4693_v46 }
 0x64d   :  { %v802_v60 = vadd.f32 %v801_v29, %v623_v52  ;;  %v879_v35 = vadd.f32 %v878_v33, %v631_v7  ;;  %v1359_v49 = vmax.f32 %v800_v27, 0.0  ;;  %v1361_v0 = vmax.f32 %v877_v28, 0.0 }
 0x64e   :  { %v947_v38 = vpop.f32.mrf.mxu0  ;;  %v1024_v39 = vpop.f32.mrf.mxu1  ;;  %v659_v54 = vrot.slane %v579_v41, %v4690_v45  ;;  %v655_v61 = vrot.slane %v575_v42, %v4690_v45  ;;  %v587_v27 = vrot.slane %v4625_v31, %v4690_v45  ;;  %v591_v33 = vrot.slane %v4625_v31, %v4693_v46 }
 0x64f   :  { %v1360_v43 = vmax.f32 %v802_v60, 0.0  ;;  %v1362_v44 = vmax.f32 %v879_v35, 0.0  ;;  %v948_v50 = vadd.f32 %v947_v38, %v635_v26  ;;  %v1025_v51 = vadd.f32 %v1024_v39, %v643_v34 }
 0x650   :  { %v949_v52 = vpop.f32.mrf.mxu0  ;;  %v1026_v7 = vpop.f32.mrf.mxu1  ;;  %v667_v31 = vrot.slane %v587_v27, %v4690_v45 }
 0x651   :  { %v950_v53 = vadd.f32 %v949_v52, %v639_v36  ;;  %v1027_v3 = vadd.f32 %v1026_v7, %v647_v37  ;;  %1484 = vmatprep.mubr.f32.mxu0 %v1360_v43  ;;  %1559 = vmatprep.mubr.f32.mxu1 %v1362_v44  ;;  %v1347_v13 = vmax.f32 %v948_v50, 0.0  ;;  %v1349_v21 = vmax.f32 %v1025_v51, 0.0 }
 0x652   :  { %v953_v20 = vpop.f32.mrf.mxu0  ;;  %v1030_v57 = vpop.f32.mrf.mxu1  ;;  %1485 = vmatmul.mubr.f32.gmra.mxu0 %v1359_v49  ;;  %1560 = vmatmul.mubr.f32.gmra.mxu1 %v1361_v0  ;;  %v671_v44 = vrot.slane %v591_v33, %v4690_v45 }
 0x653   :  { %v1348_v63 = vmax.f32 %v950_v53, 0.0  ;;  %v1350_v6 = vmax.f32 %v1027_v3, 0.0  ;;  %v954_v14 = vadd.f32 %v953_v20, %v635_v26  ;;  %v1031_v15 = vadd.f32 %v1030_v57, %v643_v34 }
 0x654   :  { %v955_v16 = vpop.f32.mrf.mxu0  ;;  %v1032_v17 = vpop.f32.mrf.mxu1  ;;  %v595_v26 = vrot.slane %v4627_v32, %v4690_v45 }
 0x655   :  { %v956_v18 = vadd.f32 %v955_v16, %v639_v36  ;;  %v1033_v19 = vadd.f32 %v1032_v17, %v647_v37  ;;  %1629 = vmatprep.mubr.f32.mxu0 %v1348_v63  ;;  %1704 = vmatprep.mubr.f32.mxu1 %v1350_v6  ;;  %v1363_v34 = vmax.f32 %v954_v14, 0.0  ;;  %v1365_v59 = vmax.f32 %v1031_v15, 0.0 }
 0x656   :  { %v1101_v24 = vpop.f32.mrf.mxu0  ;;  %v1178_v25 = vpop.f32.mrf.mxu1  ;;  %1630 = vmatmul.mubr.f32.vlgmr.msra.gmra.mxu0 %v1347_v13  ;;  %1705 = vmatmul.mubr.f32.vlgmr.msra.gmra.mxu1 %v1349_v21  ;;  %v675_v43 = vrot.slane %v595_v26, %v4690_v45 }
 0x657   :  { %v1364_v28 = vmax.f32 %v956_v18, 0.0  ;;  %v1366_v29 = vmax.f32 %v1033_v19, 0.0  ;;  %1746 = vmatpush1.xpose.msra.mxu0 %v4710_v62  ;;  %1821 = vmatpush1.xpose.msra.mxu1 %v4712_v55  ;;  %v1102_v60 = vadd.f32 %v1101_v24, %v651_v58  ;;  %v1179_v35 = vadd.f32 %v1178_v25, %v659_v54 }
 0x658   :  { %v1103_v36 = vpop.f32.mrf.mxu0  ;;  %v1180_v37 = vpop.f32.mrf.mxu1  ;;  %1895 = vmatprep.subr.mxu0 %v1405_v10  ;;  %1970 = vmatprep.subr.mxu1 %v1406_v11  ;;  %v599_v62 = vrot.slane %v4627_v32, %v4693_v46 }
 0x659   :  { %v1104_v38 = vadd.f32 %v1103_v36, %v655_v61  ;;  %v1181_v39 = vadd.f32 %v1180_v37, %v663_v22  ;;  %1634 = vmatprep.mubr.f32.mxu0 %v1364_v28  ;;  %1709 = vmatprep.mubr.f32.mxu1 %v1366_v29  ;;  %v1351_v49 = vmax.f32 %v1102_v60, 0.0  ;;  %v1353_v0 = vmax.f32 %v1179_v35, 0.0  ;;  %v4224_v36 = vld [vmem:[%s5096_s1 + $0xa] ss:$0 sm:$0xff] }
 0x65a   :  { %v1107_v55 = vpop.f32.mrf.mxu0  ;;  %v1184_v40 = vpop.f32.mrf.mxu1  ;;  %1635 = vmatmul.mubr.f32.gmra.mxu0 %v1363_v34  ;;  %1710 = vmatmul.mubr.f32.gmra.mxu1 %v1365_v59  ;;  %v679_v3 = vrot.slane %v599_v62, %v4690_v45 }
 0x65b   :  { %v1352_v41 = vmax.f32 %v1104_v38, 0.0  ;;  %v1354_v42 = vmax.f32 %v1181_v39, 0.0  ;;  %v1108_v50 = vadd.f32 %v1107_v55, %v651_v58  ;;  %v1185_v51 = vadd.f32 %v1184_v40, %v659_v54 }
 0x65c   :  { %v1109_v52 = vpop.f32.mrf.mxu0  ;;  %v1186_v7 = vpop.f32.mrf.mxu1 }
 0x65d   :  { %v1110_v53 = vadd.f32 %v1109_v52, %v655_v61  ;;  %v1187_v32 = vadd.f32 %v1186_v7, %v663_v22  ;;  %1779 = vmatprep.mubr.f32.mxu0 %v1352_v41  ;;  %1854 = vmatprep.mubr.f32.mxu1 %v1354_v42  ;;  %v1367_v58 = vmax.f32 %v1108_v50, 0.0  ;;  %v1369_v54 = vmax.f32 %v1185_v51, 0.0 }
 0x65e   :  { %v1255_v56 = vpop.f32.mrf.mxu0  ;;  %v1332_v20 = vpop.f32.mrf.mxu1  ;;  %1780 = vmatmul.mubr.f32.vlgmr.msra.gmra.mxu0 %v1351_v49  ;;  %1855 = vmatmul.mubr.f32.vlgmr.msra.gmra.mxu1 %v1353_v0 }
 0x65f   :  { %v1368_v57 = vmax.f32 %v1110_v53, 0.0  ;;  %v1370_v63 = vmax.f32 %v1187_v32, 0.0  ;;  %1896 = vmatpush1.xpose.msra.mxu0 %v4739_v47  ;;  %1971 = vmatpush1.xpose.msra.mxu1 %v4741_v48  ;;  %v1256_v6 = vadd.f32 %v1255_v56, %v667_v31  ;;  %v1333_v10 = vadd.f32 %v1332_v20, %v675_v43 }
 0x660   :  { %v1257_v61 = vpop.f32.mrf.mxu0  ;;  %v1334_v11 = vpop.f32.mrf.mxu1  ;;  %4317 = vmatprep.subr.mxu0 %v4433_v5  ;;  %4322 = vmatprep.subr.mxu1 %v4433_v5 }
 0x661   :  { %v1258_v13 = vadd.f32 %v1257_v61, %v671_v44  ;;  %v1335_v21 = vadd.f32 %v1334_v11, %v679_v3  ;;  %1784 = vmatprep.mubr.f32.mxu0 %v1368_v57  ;;  %1859 = vmatprep.mubr.f32.mxu1 %v1370_v63  ;;  %v1355_v16 = vmax.f32 %v1256_v6, 0.0  ;;  %v1357_v17 = vmax.f32 %v1333_v10, 0.0 }
 0x662   :  { %v1261_v14 = vpop.f32.mrf.mxu0  ;;  %v1338_v15 = vpop.f32.mrf.mxu1  ;;  %1785 = vmatmul.mubr.f32.gmra.mxu0 %v1367_v58  ;;  %1860 = vmatmul.mubr.f32.gmra.mxu1 %v1369_v54 }
 0x663   :  { %v1356_v47 = vmax.f32 %v1258_v13, 0.0  ;;  %v1358_v48 = vmax.f32 %v1335_v21, 0.0  ;;  %v1262_v18 = vadd.f32 %v1261_v14, %v667_v31  ;;  %v1339_v19 = vadd.f32 %v1338_v15, %v675_v43 }
 0x664   :  { %v1263_v22 = vpop.f32.mrf.mxu0  ;;  %v1340_v24 = vpop.f32.mrf.mxu1 }
 0x665   :  { %v1264_v25 = vadd.f32 %v1263_v22, %v671_v44  ;;  %v1341_v27 = vadd.f32 %v1340_v24, %v679_v3  ;;  %1929 = vmatprep.mubr.f32.mxu0 %v1356_v47  ;;  %2004 = vmatprep.mubr.f32.mxu1 %v1358_v48  ;;  %v1371_v26 = vmax.f32 %v1262_v18, 0.0  ;;  %v1373_v33 = vmax.f32 %v1339_v19, 0.0 }
 0x666   :  { %1930 = vmatmul.mubr.f32.vlgmr.msra.gmra.mxu0 %v1355_v16  ;;  %2005 = vmatmul.mubr.f32.vlgmr.msra.gmra.mxu1 %v1357_v17 }
 0x667   :  { %v1372_v28 = vmax.f32 %v1264_v25, 0.0  ;;  %v1374_v29 = vmax.f32 %v1341_v27, 0.0 }
 0x669   :  { %1934 = vmatprep.mubr.f32.mxu0 %v1372_v28  ;;  %2009 = vmatprep.mubr.f32.mxu1 %v1374_v29 }
 0x66a   :  { %1935 = vmatmul.mubr.f32.gmra.mxu0 %v1371_v26  ;;  %2010 = vmatmul.mubr.f32.gmra.mxu1 %v1373_v33 }
 0x66b   :  { %4319 = vmatprep.mubr.msk.f32.mxu0 %vm4434_vm0, %v4433_v5  ;;  %4324 = vmatprep.mubr.msk.f32.mxu1 %vm4434_vm0, %v4433_v5 }
 0x70a   :  { %v1481_v34 = vpop.f32.mrf.mxu0  ;;  %v1556_v59 = vpop.f32.mrf.mxu1 }
 0x70b   :  { %v1482_v55 = vadd.f32 %v4224_v36, %v1481_v34 }
 0x70c   :  { %v1483_v60 = vpop.f32.mrf.mxu0  ;;  %v1558_v35 = vpop.f32.mrf.mxu1 }
 0x70d   :  { %v1557_v43 = vadd.f32 %v1556_v59, %v1482_v55 }
 0x712   :  { %v1486_v37 = vpop.f32.mrf.mxu0  ;;  %v1561_v38 = vpop.f32.mrf.mxu1 }
 0x713   :  { %v1487_v44 = vadd.f32 %v4224_v36, %v1486_v37 }
 0x714   :  { %v1488_v39 = vpop.f32.mrf.mxu0  ;;  %v1563_v62 = vpop.f32.mrf.mxu1 }
 0x715   :  { %v1562_v7 = vadd.f32 %v1561_v38, %v1487_v44  ;;  %v4225_v44 = vld [vmem:[%s5096_s1 + $0xb] ss:$0 sm:$0xff] }
 0x716   :  { %v1631_v40 = vpop.f32.mrf.mxu0  ;;  %v1706_v31 = vpop.f32.mrf.mxu1 }
 0x717   :  { %v1632_v50 = vadd.f32 %v1631_v40, %v1557_v43 }
 0x718   :  { %v1633_v41 = vpop.f32.mrf.mxu0  ;;  %v1708_v42 = vpop.f32.mrf.mxu1 }
 0x719   :  { %v1707_v3 = vadd.f32 %v1706_v31, %v1632_v50 }
 0x71a   :  { %v1636_v49 = vpop.f32.mrf.mxu0  ;;  %v1711_v0 = vpop.f32.mrf.mxu1 }
 0x71b   :  { %v1637_v56 = vadd.f32 %v1636_v49, %v1562_v7 }
 0x71c   :  { %v1638_v51 = vpop.f32.mrf.mxu0  ;;  %v1713_v52 = vpop.f32.mrf.mxu1 }
 0x71d   :  { %v1712_v6 = vadd.f32 %v1711_v0, %v1637_v56  ;;  %v4226_v0 = vld [vmem:[%s5096_s1 + $0xc] ss:$0 sm:$0xff] }
 0x71e   :  { %v1781_v53 = vpop.f32.mrf.mxu0  ;;  %v1856_v32 = vpop.f32.mrf.mxu1 }
 0x71f   :  { %v1782_v63 = vadd.f32 %v1781_v53, %v1707_v3  ;;  %v2055_v3 = vld [vmem:[%s5096_s1 + $0xd] sm:$0x7] }
 0x720   :  { %v1783_v20 = vpop.f32.mrf.mxu0  ;;  %v1858_v57 = vpop.f32.mrf.mxu1  ;;  %v2091_v56 = vrot.slane %v2055_v3, %v4498_v9 }
 0x721   :  { %v1857_v11 = vadd.f32 %v1856_v32, %v1782_v63  ;;  %v2077_v20 = vrot.slane %v2055_v3, %v4495_v8 }
 0x722   :  { %v1786_v58 = vpop.f32.mrf.mxu0  ;;  %v1861_v54 = vpop.f32.mrf.mxu1 }
 0x723   :  { %v1787_v13 = vadd.f32 %v1786_v58, %v1712_v6  ;;  %v2107_v6 = vrot.slane %v2055_v3, %v4504_v12 }
 0x724   :  { %v1788_v10 = vpop.f32.mrf.mxu0  ;;  %v1863_v61 = vpop.f32.mrf.mxu1 }
 0x725   :  { %v1862_v16 = vadd.f32 %v1861_v54, %v1787_v13  ;;  %v4227_v13 = vld [vmem:[%s5096_s1 + $0x10] ss:$0 sm:$0xff] }
 0x726   :  { %v1931_v21 = vpop.f32.mrf.mxu0  ;;  %v2006_v14 = vpop.f32.mrf.mxu1 }
 0x727   :  { %v1932_v15 = vadd.f32 %v1931_v21, %v1857_v11 }
 0x728   :  { %v1933_v47 = vpop.f32.mrf.mxu0  ;;  %v2008_v48 = vpop.f32.mrf.mxu1 }
 0x729   :  { %v2007_v17 = vadd.f32 %v2006_v14, %v1932_v15 }
 0x72a   :  { %v1936_v18 = vpop.f32.mrf.mxu0  ;;  %v2011_v19 = vpop.f32.mrf.mxu1 }
 0x72b   :  { %v1937_v22 = vadd.f32 %v1936_v18, %v1862_v16  ;;  %v2015_v24 = vadd.f32 %v2007_v17, %v4602_v23 }
 0x72c   :  { %v1938_v25 = vpop.f32.mrf.mxu0  ;;  %v2013_v27 = vpop.f32.mrf.mxu1 }
 0x72d   :  { %v2012_v28 = vadd.f32 %v2011_v19, %v1937_v22  ;;  %v2017_v29 = vsel %vm86_vm1, %v2015_v24, 0.0 }
 0x72e   :  { %2018 = vadd.xlane.f32.xlu0 %v2017_v29 }
 0x72f   :  { %v2016_v26 = vadd.f32 %v2012_v28, %v4623_v30 }
 0x731   :  { %v2020_v33 = vsel %vm86_vm1, %v2016_v26, 0.0 }
 0x732   :  { %2021 = vadd.xlane.f32.xlu1 %v2020_v33 }
 0x7b7   :  { %v2019_v34 = vpop.xlane.xlu0 %2018 }
 0x7b8   :  { %v2023_v59 = vmul.f32 0.33333334, %v2019_v34 }
 0x7ba   :  { %v2025_v60 = vsub.f32 %v2015_v24, %v2023_v59 }
 0x7bb   :  { %v2022_v35 = vpop.xlane.xlu1 %2021 }
 0x7bc   :  { %v2024_v36 = vmul.f32 0.33333334, %v2022_v35  ;;  %v2027_v37 = vmul.f32 %v2025_v60, %v2025_v60 }
 0x7be   :  { %v2026_v38 = vsub.f32 %v2016_v26, %v2024_v36  ;;  %v2029_v23 = vsel %vm86_vm1, %v2027_v37, 0.0 }
 0x7bf   :  { %2030 = vadd.xlane.f32.xlu0 %v2029_v23 }
 0x7c0   :  { %v2028_v39 = vmul.f32 %v2026_v38, %v2026_v38 }
 0x7c2   :  { %v2032_v62 = vsel %vm86_vm1, %v2028_v39, 0.0 }
 0x7c3   :  { %2033 = vadd.xlane.f32.xlu1 %v2032_v62 }
 0x848   :  { %v2031_v55 = vpop.xlane.xlu0 %2030 }
 0x849   :  { %v2035_v40 = vmul.f32 0.33333334, %v2031_v55 }
 0x84b   :  { %v2037_v30 = vadd.f32 1e-05, %v2035_v40 }
 0x84c   :  { %v2034_v31 = vpop.xlane.xlu1 %2033 }
 0x84d   :  { %4388 = vrsqrt.f32 %v2037_v30  ;;  %v2036_v41 = vmul.f32 0.33333334, %v2034_v31 }
 0x84f   :  { %v2038_v42 = vadd.f32 1e-05, %v2036_v41 }
 0x851   :  { %4390 = vrsqrt.f32 %v2038_v42 }
 0x85a   :  { %v4389_v43 = vpop.eup %4388 }
 0x85b   :  { %v2041_v49 = vmul.f32 %v4389_v43, %v2025_v60 }
 0x85d   :  { %v2047_v50 = vmul.f32 %v4225_v44, %v2041_v49 }
 0x85e   :  { %v4391_v51 = vpop.eup %4390 }
 0x85f   :  { %v4790_v52 = vadd.f32 %v4226_v0, %v2047_v50  ;;  %v2042_v7 = vmul.f32 %v4391_v51, %v2026_v38 }
 0x861   :  { %2081 = vperm.xlu1 %4359, %v4790_v52   ;;  %2066 = vperm.xlu0 %4358, %v4790_v52   ;;  %v2048_v53 = vmul.f32 %v4225_v44, %v2042_v7 }
 0x863   :  { %v4797_v32 = vadd.f32 %v4226_v0, %v2048_v53 }
 0x865   :  { %4360 = vset.pattern.permute.xlu1 %v4430_v1  ;;  %4365 = vset.pattern.permute.xlu0 %v4432_v4 }
 0x866   :  { %2097 = vperm.xlu1 %4360, %v4790_v52  }
 0x86a   :  { %4361 = vset.pattern.permute.xlu1 %v4431_v2 }
 0x86b   :  { %2071 = vperm.xlu1 %4361, %v4797_v32  }
 0x86f   :  { %4362 = vset.pattern.permute.xlu1 %v4432_v4 }
 0x870   :  { %2085 = vperm.xlu1 %4362, %v4797_v32  }
 0x874   :  { %4363 = vset.pattern.permute.xlu1 %v4430_v1 }
 0x875   :  { %2101 = vperm.xlu1 %4363, %v4797_v32  }
 0x879   :  { %4364 = vset.pattern.permute.xlu1 %v4431_v2 }
 0x8dc   :  { %v2082_v57 = vpop.permute.xlu1 %2081  ;;  %v2067_v63 = vpop.permute.xlu0 %2066 }
 0x8dd   :  { %v2092_v58 = vmul.f32 %v2091_v56, %v2082_v57  ;;  %v2078_v54 = vmul.f32 %v2077_v20, %v2067_v63 }
 0x8df   :  { %v2094_v61 = vadd.f32 %v2092_v58, %v2078_v54 }
 0x8e1   :  { %v2098_v10 = vpop.permute.xlu1 %2097 }
 0x8e2   :  { %v2108_v11 = vmul.f32 %v2107_v6, %v2098_v10  ;;  %v2057_v10 = vld [vmem:[%s5096_s1 + $0x11] sm:$0x7] }
 0x8e4   :  { %v2110_v21 = vadd.f32 %v2108_v11, %v2094_v61  ;;  %v2481_v61 = vrot.slane %v2057_v10, %v4498_v9  ;;  %v2467_v11 = vrot.slane %v2057_v10, %v4495_v8 }
 0x8e6   :  { %v2072_v14 = vpop.permute.xlu1 %2071  ;;  %v2116_v15 = vadd.f32 %v4227_v13, %v2110_v21 }
 0x8e7   :  { %v2079_v16 = vmul.f32 %v2077_v20, %v2072_v14 }
 0x8e8   :  { %2119 = vrot.lane.b32.xlu1 %v2116_v15, %s4435_s22 }
 0x8eb   :  { %v2086_v47 = vpop.permute.xlu1 %2085 }
 0x8ec   :  { %v2093_v48 = vmul.f32 %v2091_v56, %v2086_v47  ;;  %v2497_v47 = vrot.slane %v2057_v10, %v4504_v12 }
 0x8ee   :  { %v2095_v18 = vadd.f32 %v2093_v48, %v2079_v16 }
 0x8f0   :  { %v2102_v17 = vpop.permute.xlu1 %2101 }
 0x8f1   :  { %v2109_v19 = vmul.f32 %v2107_v6, %v2102_v17 }
 0x8f3   :  { %v2111_v22 = vadd.f32 %v2109_v19, %v2095_v18 }
 0x8f5   :  { %v2117_v24 = vadd.f32 %v4227_v13, %v2111_v22 }
 0x8f7   :  { %2196 = vrot.lane.b32.xlu1 %v2117_v24, %s4435_s22 }
 0x95a   :  { %v2120_v25 = vpop.permute.xlu1 %2119 }
 0x95b   :  { %4318 = vmatpush3.xpose.msk.msra.mxu0 %vm86_vm1, %v2120_v25 }
 0x95c   :  { %4327 = vmatprep.subr.mxu0 %v4433_v5 }
 0x95e   :  { %4320 = vmatmul.mubr.msk.f32.vlgmr.msra.gmra.mxu0 %vm86_vm1, %v2116_v15 }
 0x95f   :  { %4329 = vmatprep.mubr.msk.f32.mxu0 %vm4434_vm0, %v4433_v5 }
 0x969   :  { %v2197_v27 = vpop.permute.xlu1 %2196 }
 0x96a   :  { %4323 = vmatpush3.xpose.msk.msra.mxu1 %vm86_vm1, %v2197_v27 }
 0x96b   :  { %4332 = vmatprep.subr.mxu1 %v4433_v5 }
 0x96d   :  { %4325 = vmatmul.mubr.msk.f32.vlgmr.msra.gmra.mxu1 %vm86_vm1, %v2117_v24 }
 0x96e   :  { %4334 = vmatprep.mubr.msk.f32.mxu1 %vm4434_vm0, %v4433_v5 }
 0xa1e   :  { %v2191_v28 = vpop.f32.mrf.mxu0 }
 0xa1f   :  { %v2272_v29 = vmul.f32 0.57735026, %v2191_v28 }
 0xa20   :  { %v4321_v26 = vpop.f32.mrf.mxu0 }
 0xa21   :  { %v2274_v33 = vsel %vm240_vm2, %v2272_v29, -inf }
 0xa22   :  { %2275 = vmax.xlane.f32.xlu1 %v2274_v33 }
 0xa2d   :  { %v2268_v34 = vpop.f32.mrf.mxu1 }
 0xa2e   :  { %v2273_v59 = vmul.f32 0.57735026, %v2268_v34 }
 0xa2f   :  { %v4326_v60 = vpop.f32.mrf.mxu1 }
 0xa30   :  { %v2277_v35 = vsel %vm240_vm2, %v2273_v59, -inf }
 0xa31   :  { %2278 = vmax.xlane.f32.xlu0 %v2277_v35 }
 0xaab   :  { %v2276_v36 = vpop.xlane.xlu1 %2275 }
 0xaac   :  { %v2280_v37 = vsub.f32 %v2272_v29, %v2276_v36 }
 0xaae   :  { %v2282_v38 = vmul.f32 1.442695, %v2280_v37 }
 0xab0   :  { %4392 = vpow2.f32 %v2282_v38 }
 0xaba   :  { %v2279_v23 = vpop.xlane.xlu0 %2278 }
 0xabb   :  { %v2281_v39 = vsub.f32 %v2273_v59, %v2279_v23 }
 0xabd   :  { %v4393_v62 = vpop.eup %4392  ;;  %v2284_v55 = vmul.f32 1.442695, %v2281_v39 }
 0xabe   :  { %v2286_v40 = vsel %vm240_vm2, %v4393_v62, 0.0 }
 0xabf   :  { %4394 = vpow2.f32 %v2284_v55  ;;  %2287 = vadd.xlane.f32.xlu0 %v2286_v40 }
 0xacc   :  { %v4395_v30 = vpop.eup %4394 }
 0xacd   :  { %v2289_v31 = vsel %vm240_vm2, %v4395_v30, 0.0 }
 0xace   :  { %2290 = vadd.xlane.f32.xlu1 %v2289_v31 }
 0xad5   :  { %2302 = vrot.lane.b32.xlu0 %v2116_v15, %s4436_s23 }
 0xadf   :  { %2378 = vrot.lane.b32.xlu1 %v2117_v24, %s4436_s23 }
 0xb48   :  { %v2288_v41 = vpop.xlane.xlu0 %2287 }
 0xb49   :  { %4396 = vrcp.f32 %v2288_v41 }
 0xb4c   :  { %v2303_v42 = vpop.permute.xlu0 %2302 }
 0xb4d   :  { %4328 = vmatpush3.msra.mxu0 %v2303_v42 }
 0xb56   :  { %v4397_v43 = vpop.eup %4396 }
 0xb57   :  { %v2294_v44 = vmul.f32 %v4397_v43, %v2288_v41  ;;  %v2291_v49 = vpop.xlane.xlu1 %2290 }
 0xb58   :  { %4398 = vrcp.f32 %v2291_v49 }
 0xb59   :  { %v2296_v0 = vsub.f32 2.0, %v2294_v44 }
 0xb5b   :  { %v2298_v50 = vmul.f32 %v4397_v43, %v2296_v0  ;;  %v2379_v51 = vpop.permute.xlu1 %2378 }
 0xb5c   :  { %4333 = vmatpush3.msra.mxu1 %v2379_v51 }
 0xb5d   :  { %v2300_v7 = vmul.f32 %v4393_v62, %v2298_v50 }
 0xb5f   :  { %4330 = vmatmul.mubr.msk.f32.vlgmr.msra.gmra.mxu0 %vm240_vm2, %v2300_v7 }
 0xb60   :  { %2823 = vmatprep.mubr.f32.mxu0 %v4433_v5 }
 0xb65   :  { %v4399_v53 = vpop.eup %4398 }
 0xb66   :  { %v2295_v3 = vmul.f32 %v4399_v53, %v2291_v49  ;;  %v4238_v49 = vld [vmem:[%s5097_s2 + $0x28] sm:$0xff] }
 0xb67   :  { %v4877_v0 = vunpack.c.l.bf16 %v4238_v49  ;;  %v4879_v50 = vunpack.c.h.bf16 %v4238_v49 }
 0xb68   :  { %v2297_v56 = vsub.f32 2.0, %v2295_v3 }
 0xb69   :  { %v2715_v51 = vcombine.high %v4877_v0, %v4877_v0  ;;  %v2716_v7 = vcombine.high %v4879_v50, %v4879_v50 }
 0xb6a   :  { %v2299_v20 = vmul.f32 %v4399_v53, %v2297_v56 }
 0xb6c   :  { %v2301_v57 = vmul.f32 %v4395_v30, %v2299_v20 }
 0xb6e   :  { %4335 = vmatmul.mubr.msk.f32.vlgmr.msra.gmra.mxu1 %vm240_vm2, %v2301_v57 }
 0xb6f   :  { %2900 = vmatprep.mubr.f32.mxu1 %v4433_v5 }
 0xc1f   :  { %v2374_v63 = vpop.f32.mrf.mxu0 }
 0xc20   :  { %2471 = vperm.xlu0 %4365, %v2374_v63   ;;  %2456 = vperm.xlu1 %4364, %v2374_v63  }
 0xc21   :  { %v4331_v58 = vpop.f32.mrf.mxu0 }
 0xc24   :  { %4366 = vset.pattern.permute.xlu1 %v4430_v1 }
 0xc25   :  { %2487 = vperm.xlu1 %4366, %v2374_v63   ;;  %v4239_v63 = vld [vmem:[%s5097_s2 + $0x30] sm:$0xff] }
 0xc29   :  { %4367 = vset.pattern.permute.xlu1 %v4431_v2 }
 0xc2e   :  { %v2450_v54 = vpop.f32.mrf.mxu1 }
 0xc2f   :  { %2475 = vperm.xlu0 %4365, %v2450_v54   ;;  %2461 = vperm.xlu1 %4367, %v2450_v54  }
 0xc30   :  { %v4336_v6 = vpop.f32.mrf.mxu1 }
 0xc33   :  { %4368 = vset.pattern.permute.xlu1 %v4430_v1  ;;  %4370 = vset.pattern.permute.xlu0 %v4431_v2 }
 0xc34   :  { %2491 = vperm.xlu1 %4368, %v2450_v54   ;;  %v4235_v54 = vld [vmem:[%s5096_s1 + $0x15] ss:$0 sm:$0xff] }
 0xc38   :  { %4369 = vset.pattern.permute.xlu1 %v4431_v2  ;;  %v4234_v2 = vld [vmem:[%s5096_s1 + $0x14] ss:$0 sm:$0xff] }
 0xc9b   :  { %v2472_v13 = vpop.permute.xlu0 %2471  ;;  %v2457_v21 = vpop.permute.xlu1 %2456 }
 0xc9c   :  { %v2482_v14 = vmul.f32 %v2481_v61, %v2472_v13  ;;  %v2468_v15 = vmul.f32 %v2467_v11, %v2457_v21  ;;  %v4898_v13 = vunpack.c.h.bf16 %v4239_v63 }
 0xc9e   :  { %v2484_v16 = vadd.f32 %v2482_v14, %v2468_v15 }
 0xca0   :  { %v2488_v48 = vpop.permute.xlu1 %2487 }
 0xca1   :  { %v2498_v17 = vmul.f32 %v2497_v47, %v2488_v48 }
 0xca3   :  { %v2500_v18 = vadd.f32 %v2498_v17, %v2484_v16 }
 0xca5   :  { %v2506_v19 = vadd.f32 %v4234_v2, %v2500_v18 }
 0xca7   :  { %v2508_v22 = vadd.f32 %v2506_v19, %v4790_v52 }
 0xca9   :  { %v2510_v24 = vsel %vm86_vm1, %v2508_v22, 0.0 }
 0xcaa   :  { %v2476_v25 = vpop.permute.xlu0 %2475  ;;  %2511 = vadd.xlane.f32.xlu0 %v2510_v24  ;;  %v2462_v27 = vpop.permute.xlu1 %2461 }
 0xcab   :  { %v2483_v28 = vmul.f32 %v2481_v61, %v2476_v25  ;;  %v2469_v29 = vmul.f32 %v2467_v11, %v2462_v27  ;;  %v4236_v61 = vld [vmem:[%s5096_s1 + $0x16] ss:$0 sm:$0xff]  ;;  %v4896_v11 = vunpack.c.l.bf16 %v4239_v63  ;;  %v4273_v27 = vld [vmem:[%s5098_s3 + $0x20] sm:$0xff] }
 0xcad   :  { %v2485_v33 = vadd.f32 %v2483_v28, %v2469_v29  ;;  %v2717_v15 = vcombine.high %v4896_v11, %v4896_v11  ;;  %v3412_v28 = vunpack.c.l.bf16 %v4273_v27  ;;  %v3413_v29 = vunpack.c.h.bf16 %v4273_v27 }
 0xcaf   :  { %v2492_v26 = vpop.permute.xlu1 %2491 }
 0xcb0   :  { %v2499_v34 = vmul.f32 %v2497_v47, %v2492_v26  ;;  %v2718_v47 = vcombine.high %v4898_v13, %v4898_v13  ;;  %v3432_v26 = vcombine.high %v3412_v28, %v3412_v28 }
 0xcb2   :  { %v2501_v59 = vadd.f32 %v2499_v34, %v2485_v33  ;;  %v3433_v33 = vcombine.high %v3413_v29, %v3413_v29 }
 0xcb4   :  { %v2507_v60 = vadd.f32 %v4234_v2, %v2501_v59  ;;  %v4240_v2 = vld [vmem:[%s5097_s2 + $0x38] sm:$0xff] }
 0xcb5   :  { %v4923_v19 = vunpack.c.l.bf16 %v4240_v2 }
 0xcb6   :  { %v2509_v35 = vadd.f32 %v2507_v60, %v4797_v32  ;;  %v4237_v32 = vld [vmem:[%s5097_s2 + $0x20] sm:$0xff] }
 0xcb7   :  { %v4860_v41 = vunpack.c.l.bf16 %v4237_v32  ;;  %v4862_v42 = vunpack.c.h.bf16 %v4237_v32  ;;  %v2719_v24 = vcombine.high %v4923_v19, %v4923_v19 }
 0xcb8   :  { %v2513_v36 = vsel %vm86_vm1, %v2509_v35, 0.0 }
 0xcb9   :  { %2514 = vadd.xlane.f32.xlu1 %v2513_v36  ;;  %v2713_v43 = vcombine.high %v4860_v41, %v4860_v41  ;;  %v2714_v44 = vcombine.high %v4862_v42, %v4862_v42  ;;  %v2572_v36 = vrot.slane %v4860_v41, %v4690_v45 }
 0xcbb   :  { %4241 = vmatprep.subr.msk.mxu0 %vm694_vm3, %v2713_v43  ;;  %4245 = vmatprep.subr.msk.mxu1 %vm694_vm3, %v2714_v44 }
 0xcbc   :  { %4242 = vmatpush1.msk.msra.mxu0 %vm694_vm3, %v4860_v41  ;;  %4246 = vmatpush1.msk.msra.mxu1 %vm694_vm3, %v4862_v42 }
 0xcbd   :  { %4249 = vmatprep.subr.msk.mxu0 %vm694_vm3, %v2715_v51  ;;  %4253 = vmatprep.subr.msk.mxu1 %vm694_vm3, %v2716_v7 }
 0xd33   :  { %v2512_v37 = vpop.xlane.xlu0 %2511 }
 0xd34   :  { %v2516_v38 = vmul.f32 0.33333334, %v2512_v37  ;;  %v2580_v37 = vrot.slane %v4862_v42, %v4690_v45 }
 0xd36   :  { %v2518_v52 = vsub.f32 %v2508_v22, %v2516_v38  ;;  %v4925_v22 = vunpack.c.h.bf16 %v4240_v2  ;;  %v2576_v38 = vrot.slane %v4860_v41, %v4693_v46 }
 0xd38   :  { %v2520_v23 = vmul.f32 %v2518_v52, %v2518_v52  ;;  %v2720_v25 = vcombine.high %v4925_v22, %v4925_v22 }
 0xd3a   :  { %v2522_v39 = vsel %vm86_vm1, %v2520_v23, 0.0  ;;  %v2652_v23 = vrot.slane %v2572_v36, %v4690_v45 }
 0xd3b   :  { %2523 = vadd.xlane.f32.xlu0 %v2522_v39  ;;  %v2660_v39 = vrot.slane %v2580_v37, %v4690_v45 }
 0xd42   :  { %v2515_v62 = vpop.xlane.xlu1 %2514 }
 0xd43   :  { %v2517_v55 = vmul.f32 0.33333334, %v2515_v62  ;;  %v2656_v62 = vrot.slane %v2576_v38, %v4690_v45 }
 0xd45   :  { %v2519_v40 = vsub.f32 %v2509_v35, %v2517_v55 }
 0xd47   :  { %v2521_v30 = vmul.f32 %v2519_v40, %v2519_v40 }
 0xd49   :  { %v2525_v31 = vsel %vm86_vm1, %v2521_v30, 0.0 }
 0xd4a   :  { %2526 = vadd.xlane.f32.xlu0 %v2525_v31 }
 0xdc4   :  { %v2524_v53 = vpop.xlane.xlu0 %2523 }
 0xdc5   :  { %v2528_v3 = vmul.f32 0.33333334, %v2524_v53 }
 0xdc7   :  { %v2530_v56 = vadd.f32 1e-05, %v2528_v3 }
 0xdc9   :  { %4400 = vrsqrt.f32 %v2530_v56 }
 0xdd3   :  { %v2527_v20 = vpop.xlane.xlu0 %2526 }
 0xdd4   :  { %v2529_v57 = vmul.f32 0.33333334, %v2527_v20 }
 0xdd6   :  { %v4401_v58 = vpop.eup %4400  ;;  %v2531_v6 = vadd.f32 1e-05, %v2529_v57 }
 0xdd7   :  { %v2534_v10 = vmul.f32 %v4401_v58, %v2518_v52  ;;  %v2584_v52 = vrot.slane %v4862_v42, %v4693_v46  ;;  %v2588_v58 = vrot.slane %v4877_v0, %v4690_v45 }
 0xdd8   :  { %4402 = vrsqrt.f32 %v2531_v6  ;;  %v2592_v6 = vrot.slane %v4877_v0, %v4693_v46 }
 0xdd9   :  { %v2540_v21 = vmul.f32 %v4235_v54, %v2534_v10  ;;  %v2664_v55 = vrot.slane %v2584_v52, %v4690_v45  ;;  %v2600_v10 = vrot.slane %v4879_v50, %v4693_v46 }
 0xddb   :  { %v4900_v14 = vadd.f32 %v4236_v61, %v2540_v21 }
 0xddd   :  { %4243 = vmatmul.mubr.msk.f32.vlgmr.msra.gmra.mxu0 %vm86_vm1, %v4900_v14  ;;  %4247 = vmatmul.mubr.msk.f32.vlgmr.msra.gmra.mxu1 %vm86_vm1, %v4900_v14 }
 0xdde   :  { %2829 = vmatprep.mubr.f32.mxu0 %v4433_v5  ;;  %2906 = vmatprep.mubr.f32.mxu1 %v4433_v5 }
 0xddf   :  { %4250 = vmatpush1.msk.msra.mxu0 %vm694_vm3, %v4877_v0  ;;  %4254 = vmatpush1.msk.msra.mxu1 %vm694_vm3, %v4879_v50  ;;  %v2672_v0 = vrot.slane %v2592_v6, %v4690_v45 }
 0xde0   :  { %4257 = vmatprep.subr.msk.mxu0 %vm694_vm3, %v2717_v15  ;;  %4261 = vmatprep.subr.msk.mxu1 %vm694_vm3, %v2718_v47 }
 0xde5   :  { %v4403_v48 = vpop.eup %4402 }
 0xde6   :  { %v2535_v16 = vmul.f32 %v4403_v48, %v2519_v40  ;;  %v4275_v40 = vld [vmem:[%s5098_s3 + $0x30] sm:$0xff] }
 0xde7   :  { %v5002_v49 = vunpack.c.l.bf16 %v4275_v40  ;;  %v5004_v42 = vunpack.c.h.bf16 %v4275_v40  ;;  %v2616_v40 = vrot.slane %v4898_v13, %v4693_v46 }
 0xde8   :  { %v2541_v17 = vmul.f32 %v4235_v54, %v2535_v16  ;;  %v2596_v54 = vrot.slane %v4879_v50, %v4690_v45  ;;  %v2680_v50 = vrot.slane %v2600_v10, %v4690_v45 }
 0xde9   :  { %v3436_v57 = vcombine.high %v5002_v49, %v5002_v49  ;;  %v3437_v63 = vcombine.high %v5004_v42, %v5004_v42 }
 0xdea   :  { %v4921_v18 = vadd.f32 %v4236_v61, %v2541_v17  ;;  %v2668_v17 = vrot.slane %v2588_v58, %v4690_v45  ;;  %v2676_v2 = vrot.slane %v2596_v54, %v4690_v45  ;;  %v2696_v54 = vrot.slane %v2616_v40, %v4690_v45 }
 0xdec   :  { %4244 = vmatmul.mubr.msk.f32.gmra.mxu0 %vm86_vm1, %v4921_v18  ;;  %4248 = vmatmul.mubr.msk.f32.gmra.mxu1 %vm86_vm1, %v4921_v18 }
 0xded   :  { %2977 = vmatprep.mubr.f32.mxu0 %v4433_v5  ;;  %3054 = vmatprep.mubr.f32.mxu1 %v4433_v5 }
 0xdf0   :  { %4251 = vmatmul.mubr.msk.f32.vlgmr.msra.gmra.mxu0 %vm86_vm1, %v4900_v14  ;;  %4255 = vmatmul.mubr.msk.f32.vlgmr.msra.gmra.mxu1 %vm86_vm1, %v4900_v14 }
 0xdf1   :  { %2983 = vmatprep.mubr.f32.mxu0 %v4433_v5  ;;  %3060 = vmatprep.mubr.f32.mxu1 %v4433_v5 }
 0xdf2   :  { %4258 = vmatpush1.msk.msra.mxu0 %vm694_vm3, %v4896_v11  ;;  %4262 = vmatpush1.msk.msra.mxu1 %vm694_vm3, %v4898_v13 }
 0xdf3   :  { %4265 = vmatprep.subr.msk.mxu0 %vm694_vm3, %v2719_v24  ;;  %4269 = vmatprep.subr.msk.mxu1 %vm694_vm3, %v2720_v25  ;;  %v4276_v24 = vld [vmem:[%s5098_s3 + $0x38] sm:$0xff] }
 0xdf4   :  { %4252 = vmatmul.mubr.msk.f32.gmra.mxu0 %vm86_vm1, %v4921_v18  ;;  %4256 = vmatmul.mubr.msk.f32.gmra.mxu1 %vm86_vm1, %v4921_v18 }
 0xdf5   :  { %3131 = vmatprep.mubr.f32.mxu0 %v4433_v5  ;;  %3208 = vmatprep.mubr.f32.mxu1 %v4433_v5 }
 0xdf8   :  { %4259 = vmatmul.mubr.msk.f32.vlgmr.msra.gmra.mxu0 %vm86_vm1, %v4900_v14  ;;  %4263 = vmatmul.mubr.msk.f32.vlgmr.msra.gmra.mxu1 %vm86_vm1, %v4900_v14 }
 0xdf9   :  { %3137 = vmatprep.mubr.f32.mxu0 %v4433_v5  ;;  %3214 = vmatprep.mubr.f32.mxu1 %v4433_v5 }
 0xdfa   :  { %4266 = vmatpush1.msk.msra.mxu0 %vm694_vm3, %v4923_v19  ;;  %4270 = vmatpush1.msk.msra.mxu1 %vm694_vm3, %v4925_v22 }
 0xdfb   :  { %3478 = vmatprep.subr.mxu0 %v3432_v26  ;;  %3553 = vmatprep.subr.mxu1 %v3433_v33  ;;  %v2604_v26 = vrot.slane %v4896_v11, %v4690_v45  ;;  %v2612_v33 = vrot.slane %v4898_v13, %v4690_v45 }
 0xdfc   :  { %4260 = vmatmul.mubr.msk.f32.gmra.mxu0 %vm86_vm1, %v4921_v18  ;;  %4264 = vmatmul.mubr.msk.f32.gmra.mxu1 %vm86_vm1, %v4921_v18 }
 0xdfd   :  { %3285 = vmatprep.mubr.f32.mxu0 %v4433_v5  ;;  %3362 = vmatprep.mubr.f32.mxu1 %v4433_v5 }
 0xe00   :  { %4267 = vmatmul.mubr.msk.f32.vlgmr.msra.gmra.mxu0 %vm86_vm1, %v4900_v14  ;;  %4271 = vmatmul.mubr.msk.f32.vlgmr.msra.gmra.mxu1 %vm86_vm1, %v4900_v14 }
 0xe01   :  { %3291 = vmatprep.mubr.f32.mxu0 %v4433_v5  ;;  %3368 = vmatprep.mubr.f32.mxu1 %v4433_v5  ;;  %v4274_v5 = vld [vmem:[%s5098_s3 + $0x28] sm:$0xff] }
 0xe02   :  { %3479 = vmatpush1.xpose.msra.mxu0 %v3412_v28  ;;  %3554 = vmatpush1.xpose.msra.mxu1 %v3413_v29  ;;  %v3414_v34 = vunpack.c.l.bf16 %v4274_v5  ;;  %v3415_v59 = vunpack.c.h.bf16 %v4274_v5  ;;  %v2608_v5 = vrot.slane %v4896_v11, %v4693_v46 }
 0xe04   :  { %4268 = vmatmul.mubr.msk.f32.gmra.mxu0 %vm86_vm1, %v4921_v18  ;;  %4272 = vmatmul.mubr.msk.f32.gmra.mxu1 %vm86_vm1, %v4921_v18  ;;  %v3434_v60 = vcombine.high %v3414_v34, %v3414_v34  ;;  %v3435_v35 = vcombine.high %v3415_v59, %v3415_v59 }
 0xe06   :  { %3628 = vmatprep.subr.mxu0 %v3434_v60  ;;  %3703 = vmatprep.subr.mxu1 %v3435_v35  ;;  %v5031_v60 = vunpack.c.l.bf16 %v4276_v24  ;;  %v5033_v35 = vunpack.c.h.bf16 %v4276_v24 }
 0xe9d   :  { %v2825_v30 = vpop.f32.mrf.mxu0  ;;  %v2902_v31 = vpop.f32.mrf.mxu1 }
 0xe9e   :  { %v2826_v32 = vadd.f32 %v2825_v30, %v2652_v23  ;;  %v2903_v43 = vadd.f32 %v2902_v31, %v2660_v39  ;;  %v2684_v31 = vrot.slane %v2604_v26, %v4690_v45 }
 0xe9f   :  { %v2827_v41 = vpop.f32.mrf.mxu0  ;;  %v2904_v44 = vpop.f32.mrf.mxu1 }
 0xea0   :  { %v2828_v51 = vadd.f32 %v2827_v41, %v2656_v62  ;;  %v2905_v7 = vadd.f32 %v2904_v44, %v2664_v55  ;;  %v3375_v56 = vmax.f32 %v2826_v32, 0.0  ;;  %v3377_v20 = vmax.f32 %v2903_v43, 0.0 }
 0xea1   :  { %v2692_v32 = vrot.slane %v2612_v33, %v4690_v45  ;;  %v2688_v43 = vrot.slane %v2608_v5, %v4690_v45 }
 0xea2   :  { %v3376_v53 = vmax.f32 %v2828_v51, 0.0  ;;  %v3378_v3 = vmax.f32 %v2905_v7, 0.0  ;;  %v3438_v51 = vcombine.high %v5031_v60, %v5031_v60  ;;  %v3439_v7 = vcombine.high %v5033_v35, %v5033_v35 }
 0xea4   :  { %3512 = vmatprep.mubr.f32.mxu0 %v3376_v53  ;;  %3587 = vmatprep.mubr.f32.mxu1 %v3378_v3 }
 0xea5   :  { %3513 = vmatmul.mubr.f32.vlgmr.msra.gmra.mxu0 %v3375_v56  ;;  %3588 = vmatmul.mubr.f32.vlgmr.msra.gmra.mxu1 %v3377_v20 }
 0xea6   :  { %3629 = vmatpush1.xpose.msra.mxu0 %v3414_v34  ;;  %3704 = vmatpush1.xpose.msra.mxu1 %v3415_v59 }
 0xea7   :  { %3778 = vmatprep.subr.mxu0 %v3436_v57  ;;  %3853 = vmatprep.subr.mxu1 %v3437_v63 }
 0xeac   :  { %v2831_v61 = vpop.f32.mrf.mxu0  ;;  %v2908_v21 = vpop.f32.mrf.mxu1 }
 0xead   :  { %v2832_v15 = vadd.f32 %v2831_v61, %v2652_v23  ;;  %v2909_v47 = vadd.f32 %v2908_v21, %v2660_v39  ;;  %v2620_v61 = vrot.slane %v4923_v19, %v4690_v45 }
 0xeae   :  { %v2833_v48 = vpop.f32.mrf.mxu0  ;;  %v2910_v16 = vpop.f32.mrf.mxu1 }
 0xeaf   :  { %v2834_v25 = vadd.f32 %v2833_v48, %v2656_v62  ;;  %v2911_v27 = vadd.f32 %v2910_v16, %v2664_v55  ;;  %v3391_v36 = vmax.f32 %v2832_v15, 0.0  ;;  %v3393_v37 = vmax.f32 %v2909_v47, 0.0 }
 0xeb0   :  { %v2979_v28 = vpop.f32.mrf.mxu0  ;;  %v3056_v29 = vpop.f32.mrf.mxu1  ;;  %v2628_v47 = vrot.slane %v4925_v22, %v4690_v45  ;;  %v2624_v48 = vrot.slane %v4923_v19, %v4693_v46  ;;  %v2700_v19 = vrot.slane %v2620_v61, %v4690_v45 }
 0xeb1   :  { %v3392_v34 = vmax.f32 %v2834_v25, 0.0  ;;  %v3394_v59 = vmax.f32 %v2911_v27, 0.0  ;;  %v2980_v38 = vadd.f32 %v2979_v28, %v2668_v17  ;;  %v3057_v52 = vadd.f32 %v3056_v29, %v2676_v2 }
 0xeb2   :  { %v2981_v23 = vpop.f32.mrf.mxu0  ;;  %v3058_v39 = vpop.f32.mrf.mxu1  ;;  %v2708_v33 = vrot.slane %v2628_v47, %v4690_v45  ;;  %v2704_v5 = vrot.slane %v2624_v48, %v4690_v45 }
 0xeb3   :  { %v2982_v62 = vadd.f32 %v2981_v23, %v2672_v0  ;;  %v3059_v55 = vadd.f32 %v3058_v39, %v2680_v50  ;;  %3517 = vmatprep.mubr.f32.mxu0 %v3392_v34  ;;  %3592 = vmatprep.mubr.f32.mxu1 %v3394_v59  ;;  %v3379_v53 = vmax.f32 %v2980_v38, 0.0  ;;  %v3381_v13 = vmax.f32 %v3057_v52, 0.0 }
 0xeb4   :  { %v2985_v11 = vpop.f32.mrf.mxu0  ;;  %v3062_v30 = vpop.f32.mrf.mxu1  ;;  %3518 = vmatmul.mubr.f32.gmra.mxu0 %v3391_v36  ;;  %3593 = vmatmul.mubr.f32.gmra.mxu1 %v3393_v37 }
 0xeb5   :  { %v3380_v41 = vmax.f32 %v2982_v62, 0.0  ;;  %v3382_v44 = vmax.f32 %v3059_v55, 0.0  ;;  %v2986_v3 = vadd.f32 %v2985_v11, %v2668_v17  ;;  %v3063_v56 = vadd.f32 %v3062_v30, %v2676_v2 }
 0xeb6   :  { %v2987_v20 = vpop.f32.mrf.mxu0  ;;  %v3064_v57 = vpop.f32.mrf.mxu1 }
 0xeb7   :  { %v2988_v63 = vadd.f32 %v2987_v20, %v2672_v0  ;;  %v3065_v58 = vadd.f32 %v3064_v57, %v2680_v50  ;;  %3662 = vmatprep.mubr.f32.mxu0 %v3380_v41  ;;  %3737 = vmatprep.mubr.f32.mxu1 %v3382_v44  ;;  %v3395_v16 = vmax.f32 %v2986_v3, 0.0  ;;  %v3397_v17 = vmax.f32 %v3063_v56, 0.0 }
 0xeb8   :  { %v3133_v6 = vpop.f32.mrf.mxu0  ;;  %v3210_v10 = vpop.f32.mrf.mxu1  ;;  %3663 = vmatmul.mubr.f32.vlgmr.msra.gmra.mxu0 %v3379_v53  ;;  %3738 = vmatmul.mubr.f32.vlgmr.msra.gmra.mxu1 %v3381_v13 }
 0xeb9   :  { %v3396_v21 = vmax.f32 %v2988_v63, 0.0  ;;  %v3398_v15 = vmax.f32 %v3065_v58, 0.0  ;;  %3779 = vmatpush1.xpose.msra.mxu0 %v5002_v49  ;;  %3854 = vmatpush1.xpose.msra.mxu1 %v5004_v42  ;;  %v3134_v2 = vadd.f32 %v3133_v6, %v2684_v31  ;;  %v3211_v24 = vadd.f32 %v3210_v10, %v2692_v32 }
 0xeba   :  { %v3135_v25 = vpop.f32.mrf.mxu0  ;;  %v3212_v27 = vpop.f32.mrf.mxu1  ;;  %3928 = vmatprep.subr.mxu0 %v3438_v51  ;;  %4003 = vmatprep.subr.mxu1 %v3439_v7  ;;  %v2632_v49 = vrot.slane %v4925_v22, %v4693_v46 }
 0xebb   :  { %v3136_v0 = vadd.f32 %v3135_v25, %v2688_v43  ;;  %v3213_v50 = vadd.f32 %v3212_v27, %v2696_v54  ;;  %3667 = vmatprep.mubr.f32.mxu0 %v3396_v21  ;;  %3742 = vmatprep.mubr.f32.mxu1 %v3398_v15  ;;  %v3383_v34 = vmax.f32 %v3134_v2, 0.0  ;;  %v3385_v59 = vmax.f32 %v3211_v24, 0.0 }
 0xebc   :  { %v3139_v42 = vpop.f32.mrf.mxu0  ;;  %v3216_v28 = vpop.f32.mrf.mxu1  ;;  %3668 = vmatmul.mubr.f32.gmra.mxu0 %v3395_v16  ;;  %3743 = vmatmul.mubr.f32.gmra.mxu1 %v3397_v17  ;;  %v2712_v22 = vrot.slane %v2632_v49, %v4690_v45  ;;  %v4277_v16 = vld [vmem:[%s5096_s1 + $0x17] ss:$0 sm:$0xff] }
 0xebd   :  { %v3384_v29 = vmax.f32 %v3136_v0, 0.0  ;;  %v3386_v26 = vmax.f32 %v3213_v50, 0.0  ;;  %v3140_v36 = vadd.f32 %v3139_v42, %v2684_v31  ;;  %v3217_v37 = vadd.f32 %v3216_v28, %v2692_v32 }
 0xebe   :  { %v3141_v38 = vpop.f32.mrf.mxu0  ;;  %v3218_v52 = vpop.f32.mrf.mxu1 }
 0xebf   :  { %v3142_v23 = vadd.f32 %v3141_v38, %v2688_v43  ;;  %v3219_v46 = vadd.f32 %v3218_v52, %v2696_v54  ;;  %3812 = vmatprep.mubr.f32.mxu0 %v3384_v29  ;;  %3887 = vmatprep.mubr.f32.mxu1 %v3386_v26  ;;  %v3399_v11 = vmax.f32 %v3140_v36, 0.0  ;;  %v3401_v30 = vmax.f32 %v3217_v37, 0.0 }
 0xec0   :  { %v3287_v39 = vpop.f32.mrf.mxu0  ;;  %v3364_v62 = vpop.f32.mrf.mxu1  ;;  %3813 = vmatmul.mubr.f32.vlgmr.msra.gmra.mxu0 %v3383_v34  ;;  %3888 = vmatmul.mubr.f32.vlgmr.msra.gmra.mxu1 %v3385_v59 }
 0xec1   :  { %v3400_v55 = vmax.f32 %v3142_v23, 0.0  ;;  %v3402_v40 = vmax.f32 %v3219_v46, 0.0  ;;  %3929 = vmatpush1.xpose.msra.mxu0 %v5031_v60  ;;  %4004 = vmatpush1.xpose.msra.mxu1 %v5033_v35  ;;  %v3288_v31 = vadd.f32 %v3287_v39, %v2700_v19  ;;  %v3365_v32 = vadd.f32 %v3364_v62, %v2708_v33 }
 0xec2   :  { %v3289_v43 = vpop.f32.mrf.mxu0  ;;  %v3366_v41 = vpop.f32.mrf.mxu1 }
 0xec3   :  { %v3290_v44 = vadd.f32 %v3289_v43, %v2704_v5  ;;  %v3367_v51 = vadd.f32 %v3366_v41, %v2712_v22  ;;  %3817 = vmatprep.mubr.f32.mxu0 %v3400_v55  ;;  %3892 = vmatprep.mubr.f32.mxu1 %v3402_v40  ;;  %v3387_v3 = vmax.f32 %v3288_v31, 0.0  ;;  %v3389_v60 = vmax.f32 %v3365_v32, 0.0 }
 0xec4   :  { %v3293_v45 = vpop.f32.mrf.mxu0  ;;  %v3370_v7 = vpop.f32.mrf.mxu1  ;;  %3818 = vmatmul.mubr.f32.gmra.mxu0 %v3399_v11  ;;  %3893 = vmatmul.mubr.f32.gmra.mxu1 %v3401_v30 }
 0xec5   :  { %v3388_v53 = vmax.f32 %v3290_v44, 0.0  ;;  %v3390_v13 = vmax.f32 %v3367_v51, 0.0  ;;  %v3294_v56 = vadd.f32 %v3293_v45, %v2700_v19  ;;  %v3371_v35 = vadd.f32 %v3370_v7, %v2708_v33 }
 0xec6   :  { %v3295_v20 = vpop.f32.mrf.mxu0  ;;  %v3372_v57 = vpop.f32.mrf.mxu1 }
 0xec7   :  { %v3296_v63 = vadd.f32 %v3295_v20, %v2704_v5  ;;  %v3373_v58 = vadd.f32 %v3372_v57, %v2712_v22  ;;  %3962 = vmatprep.mubr.f32.mxu0 %v3388_v53  ;;  %4037 = vmatprep.mubr.f32.mxu1 %v3390_v13  ;;  %v3403_v10 = vmax.f32 %v3294_v56, 0.0  ;;  %v3405_v61 = vmax.f32 %v3371_v35, 0.0 }
 0xec8   :  { %3963 = vmatmul.mubr.f32.vlgmr.msra.gmra.mxu0 %v3387_v3  ;;  %4038 = vmatmul.mubr.f32.vlgmr.msra.gmra.mxu1 %v3389_v60 }
 0xec9   :  { %v3404_v54 = vmax.f32 %v3296_v63, 0.0  ;;  %v3406_v6 = vmax.f32 %v3373_v58, 0.0 }
 0xecb   :  { %3967 = vmatprep.mubr.f32.mxu0 %v3404_v54  ;;  %4042 = vmatprep.mubr.f32.mxu1 %v3406_v6 }
 0xecc   :  { %3968 = vmatmul.mubr.f32.gmra.mxu0 %v3403_v10  ;;  %4043 = vmatmul.mubr.f32.gmra.mxu1 %v3405_v61 }
 0xf65   :  { %v3514_v21 = vpop.f32.mrf.mxu0  ;;  %v3589_v15 = vpop.f32.mrf.mxu1 }
 0xf66   :  { %v3515_v27 = vadd.f32 %v4277_v16, %v3514_v21 }
 0xf67   :  { %v3516_v47 = vpop.f32.mrf.mxu0  ;;  %v3591_v48 = vpop.f32.mrf.mxu1 }
 0xf68   :  { %v3590_v28 = vadd.f32 %v3589_v15, %v3515_v27 }
 0xf74   :  { %v3519_v17 = vpop.f32.mrf.mxu0  ;;  %v3594_v2 = vpop.f32.mrf.mxu1 }
 0xf75   :  { %v3520_v19 = vadd.f32 %v4277_v16, %v3519_v17 }
 0xf76   :  { %v3521_v24 = vpop.f32.mrf.mxu0  ;;  %v3596_v25 = vpop.f32.mrf.mxu1 }
 0xf77   :  { %v3595_v59 = vadd.f32 %v3594_v2, %v3520_v19 }
 0xf78   :  { %v3664_v0 = vpop.f32.mrf.mxu0  ;;  %v3739_v50 = vpop.f32.mrf.mxu1 }
 0xf79   :  { %v3665_v33 = vadd.f32 %v3664_v0, %v3590_v28 }
 0xf7a   :  { %v3666_v49 = vpop.f32.mrf.mxu0  ;;  %v3741_v42 = vpop.f32.mrf.mxu1 }
 0xf7b   :  { %v3740_v38 = vadd.f32 %v3739_v50, %v3665_v33  ;;  %v4278_v50 = vld [vmem:[%s5096_s1 + $0x18] ss:$0 sm:$0xff]  ;;  %v4279_v42 = vld [vmem:[%s5096_s1 + $0x19] ss:$0 sm:$0xff] }
 0xf7c   :  { %v3669_v29 = vpop.f32.mrf.mxu0  ;;  %v3744_v26 = vpop.f32.mrf.mxu1 }
 0xf7d   :  { %v3670_v52 = vadd.f32 %v3669_v29, %v3595_v59 }
 0xf7e   :  { %v3671_v5 = vpop.f32.mrf.mxu0  ;;  %v3746_v34 = vpop.f32.mrf.mxu1 }
 0xf7f   :  { %v3745_v55 = vadd.f32 %v3744_v26, %v3670_v52 }
 0xf80   :  { %v3814_v36 = vpop.f32.mrf.mxu0  ;;  %v3889_v37 = vpop.f32.mrf.mxu1 }
 0xf81   :  { %v3815_v22 = vadd.f32 %v3814_v36, %v3740_v38 }
 0xf82   :  { %v3816_v23 = vpop.f32.mrf.mxu0  ;;  %v3891_v46 = vpop.f32.mrf.mxu1 }
 0xf83   :  { %v3890_v30 = vadd.f32 %v3889_v37, %v3815_v22 }
 0xf84   :  { %v3819_v39 = vpop.f32.mrf.mxu0  ;;  %v3894_v62 = vpop.f32.mrf.mxu1 }
 0xf85   :  { %v3820_v31 = vadd.f32 %v3819_v39, %v3745_v55 }
 0xf86   :  { %v3821_v40 = vpop.f32.mrf.mxu0  ;;  %v3896_v11 = vpop.f32.mrf.mxu1 }
 0xf87   :  { %v3895_v45 = vadd.f32 %v3894_v62, %v3820_v31 }
 0xf88   :  { %v3964_v32 = vpop.f32.mrf.mxu0  ;;  %v4039_v43 = vpop.f32.mrf.mxu1 }
 0xf89   :  { %v3965_v41 = vadd.f32 %v3964_v32, %v3890_v30 }
 0xf8a   :  { %v3966_v44 = vpop.f32.mrf.mxu0  ;;  %v4041_v51 = vpop.f32.mrf.mxu1 }
 0xf8b   :  { %v4040_v7 = vadd.f32 %v4039_v43, %v3965_v41  ;;  %v4105_v43 = vld [vmem:[%s5096_s1 + $0x1a] sm:$0x7] }
 0xf8c   :  { %v3969_v53 = vpop.f32.mrf.mxu0  ;;  %v4044_v13 = vpop.f32.mrf.mxu1  ;;  %v4134_v41 = vrot.slane %v4105_v43, %v4498_v9  ;;  %v4120_v44 = vrot.slane %v4105_v43, %v4495_v8 }
 0xf8d   :  { %v3970_v3 = vadd.f32 %v3969_v53, %v3895_v45  ;;  %v4048_v60 = vadd.f32 %v4040_v7, %v4900_v14  ;;  %v4150_v7 = vrot.slane %v4105_v43, %v4504_v12 }
 0xf8e   :  { %v3971_v56 = vpop.f32.mrf.mxu0  ;;  %v4046_v35 = vpop.f32.mrf.mxu1 }
 0xf8f   :  { %v4045_v20 = vadd.f32 %v4044_v13, %v3970_v3  ;;  %v4050_v57 = vsel %vm86_vm1, %v4048_v60, 0.0 }
 0xf90   :  { %4051 = vadd.xlane.f32.xlu1 %v4050_v57 }
 0xf91   :  { %v4049_v63 = vadd.f32 %v4045_v20, %v4921_v18 }
 0xf93   :  { %v4053_v58 = vsel %vm86_vm1, %v4049_v63, 0.0 }
 0xf94   :  { %4054 = vadd.xlane.f32.xlu0 %v4053_v58 }
0x1019   :  { %v4052_v54 = vpop.xlane.xlu1 %4051 }
0x101a   :  { %v4056_v6 = vmul.f32 0.33333334, %v4052_v54 }
0x101c   :  { %v4058_v10 = vsub.f32 %v4048_v60, %v4056_v6 }
0x101d   :  { %v4055_v61 = vpop.xlane.xlu0 %4054 }
0x101e   :  { %v4057_v21 = vmul.f32 0.33333334, %v4055_v61  ;;  %v4060_v15 = vmul.f32 %v4058_v10, %v4058_v10 }
0x1020   :  { %v4059_v47 = vsub.f32 %v4049_v63, %v4057_v21  ;;  %v4062_v14 = vsel %vm86_vm1, %v4060_v15, 0.0 }
0x1021   :  { %4063 = vadd.xlane.f32.xlu1 %v4062_v14 }
0x1022   :  { %v4061_v48 = vmul.f32 %v4059_v47, %v4059_v47 }
0x1024   :  { %v4065_v16 = vsel %vm86_vm1, %v4061_v48, 0.0 }
0x1025   :  { %4066 = vadd.xlane.f32.xlu0 %v4065_v16 }
0x10aa   :  { %v4064_v17 = vpop.xlane.xlu1 %4063 }
0x10ab   :  { %v4068_v2 = vmul.f32 0.33333334, %v4064_v17 }
0x10ad   :  { %v4070_v18 = vadd.f32 1e-05, %v4068_v2 }
0x10ae   :  { %v4067_v24 = vpop.xlane.xlu0 %4066 }
0x10af   :  { %4404 = vrsqrt.f32 %v4070_v18  ;;  %v4069_v25 = vmul.f32 0.33333334, %v4067_v24 }
0x10b1   :  { %v4071_v27 = vadd.f32 1e-05, %v4069_v25 }
0x10b3   :  { %4406 = vrsqrt.f32 %v4071_v27 }
0x10bc   :  { %v4405_v0 = vpop.eup %4404 }
0x10bd   :  { %v4074_v49 = vmul.f32 %v4405_v0, %v4058_v10 }
0x10bf   :  { %v4080_v28 = vmul.f32 %v4278_v50, %v4074_v49 }
0x10c0   :  { %v4407_v19 = vpop.eup %4406 }
0x10c1   :  { %v4086_v29 = vadd.f32 %v4279_v42, %v4080_v28  ;;  %v4075_v26 = vmul.f32 %v4407_v19, %v4059_v47 }
0x10c3   :  { %v4088_v33 = vsel %vm86_vm1, %v4086_v29, 0.0  ;;  %v4081_v5 = vmul.f32 %v4278_v50, %v4075_v26 }
0x10c4   :  { %v4089_v34 = vrot.slane %v4088_v33, 4 }
0x10c5   :  { %v4087_v59 = vadd.f32 %v4279_v42, %v4081_v5 }
0x10c6   :  { %v4090_v36 = vadd.f32 %v4089_v34, %v4088_v33 }
0x10c7   :  { %v4095_v37 = vsel %vm86_vm1, %v4087_v59, 0.0 }
0x10c8   :  { %v4091_v38 = vrot.slane %v4090_v36, 2  ;;  %v4096_v52 = vrot.slane %v4095_v37, 4 }
0x10ca   :  { %v4092_v23 = vadd.f32 %v4091_v38, %v4090_v36  ;;  %v4097_v46 = vadd.f32 %v4096_v52, %v4095_v37 }
0x10cc   :  { %v4093_v22 = vrot.slane %v4092_v23, 1  ;;  %v4098_v39 = vrot.slane %v4097_v46, 2 }
0x10ce   :  { %v4094_v62 = vadd.f32 %v4093_v22, %v4092_v23  ;;  %v4099_v55 = vadd.f32 %v4098_v39, %v4097_v46 }
0x10d0   :  { %v4103_v40 = vmul.f32 0.125, %v4094_v62  ;;  %v4100_v11 = vrot.slane %v4099_v55, 1 }
0x10d2   :  { %4109 = vperm.xlu1 %4369, %v4103_v40   ;;  %v4101_v30 = vadd.f32 %v4100_v11, %v4099_v55 }
0x10d4   :  { %v4104_v31 = vmul.f32 0.125, %v4101_v30 }
0x10d6   :  { %4371 = vset.pattern.permute.xlu1 %v4432_v4  ;;  %4114 = vperm.xlu0 %4370, %v4104_v31  }
0x10d7   :  { %4124 = vperm.xlu1 %4371, %v4103_v40  }
0x10da   :  { %4375 = vset.pattern.permute.xlu0 %v4430_v1 }
0x10db   :  { %4372 = vset.pattern.permute.xlu1 %v4430_v1 }
0x10dc   :  { %4140 = vperm.xlu1 %4372, %v4103_v40  }
0x10e0   :  { %4373 = vset.pattern.permute.xlu1 %v4432_v4 }
0x10e1   :  { %4128 = vperm.xlu1 %4373, %v4104_v31  }
0x10e5   :  { %4374 = vset.pattern.permute.xlu1 %v4430_v1  ;;  %v4280_v1 = vld [vmem:[%s5096_s1 + $0x1d] ss:$0 sm:$0xff] }
0x10e6   :  { %4144 = vperm.xlu1 %4374, %v4104_v31  }
0x114d   :  { %v4110_v32 = vpop.permute.xlu1 %4109 }
0x114e   :  { %v4121_v53 = vmul.f32 %v4120_v44, %v4110_v32 }
0x1151   :  { %v4115_v20 = vpop.permute.xlu0 %4114 }
0x1152   :  { %v4125_v51 = vpop.permute.xlu1 %4124  ;;  %v4122_v8 = vmul.f32 %v4120_v44, %v4115_v20 }
0x1153   :  { %v4135_v45 = vmul.f32 %v4134_v41, %v4125_v51 }
0x1155   :  { %v4137_v4 = vadd.f32 %v4135_v45, %v4121_v53 }
0x1157   :  { %v4141_v13 = vpop.permute.xlu1 %4140 }
0x1158   :  { %v4151_v3 = vmul.f32 %v4150_v7, %v4141_v13 }
0x115a   :  { %v4153_v60 = vadd.f32 %v4151_v3, %v4137_v4 }
0x115c   :  { %v4159_v56 = vadd.f32 %v4280_v1, %v4153_v60  ;;  %v4129_v35 = vpop.permute.xlu1 %4128 }
0x115d   :  { %v4136_v9 = vmul.f32 %v4134_v41, %v4129_v35 }
0x115e   :  { %4164 = vst.msk [vmem:[#allocation2] sm:$0x1] %vm4163_vm4, %v4159_v56 }
0x115f   :  { %v4138_v63 = vadd.f32 %v4136_v9, %v4122_v8 }
0x1161   :  { %v4145_v57 = vpop.permute.xlu1 %4144 }
0x1162   :  { %v4152_v58 = vmul.f32 %v4150_v7, %v4145_v57 }
0x1164   :  { %v4154_v12 = vadd.f32 %v4152_v58, %v4138_v63 }
0x1166   :  { %v4160_v54 = vadd.f32 %v4280_v1, %v4154_v12 }
0x1168   :  { %4165 = vst.msk [vmem:[#allocation2 + $0x1] sm:$0x1] %vm4163_vm4, %v4160_v54 }
0x1169   :  { %4419 = shalt.err (!%p4416_p4)
}
0x116a   :  { %s4438_s1 = smov 16   ;;  %s4439_s13 = smov 1  }
0x116b   :  { %4177 = dma.vmem_to_hbm [thread:$0]  %s4172_s11, 32, %s5099_s4, [#allocation3], %s4438_s1, %s4438_s1, %s4439_s13  }
0x116c   :  { %4428 = dma.done.wait [#allocation3], 32  }
0x116d   :  { %4429 = vsyncadd [#allocation3], 4294967264 }
0x116e   :  { %4181 = vsyncpa [#allocation3], 1 }

</bundles_post_ra>
